<compile_context>
chip_gen: v7x
topology: tpu7x:2x2x1
jax: 0.10.0
libtpu: 0.0.40
codegen_flags: <defaults>
</compile_context>

<pallas_src>
import math

import jax
import jax.numpy as jnp
from jax.experimental import pallas as pl
from jax.experimental.pallas import tpu as pltpu

INPUT_SIZE = 784
HIDDEN_SIZE = 500
NUM_CLASSES = 10

HIDDEN_PAD = 512   # 500 padded to a multiple of 128 (zero-padded -> no math change)
OUT_PAD = 128      # 10 padded to a full lane width (sliced back in the wrapper)


def _round_up(n, m):
    return ((n + m - 1) // m) * m


def mlp_kernel(x_ref, w1_ref, b1_ref, w2_ref, b2_ref, o_ref):
    # Layer 1: (TM, 784) bf16 @ (784, 512) bf16 -> f32 accumulate on the MXU.
    h = jnp.dot(x_ref[...].astype(jnp.bfloat16), w1_ref[...],
                preferred_element_type=jnp.float32)
    # Bias + ReLU in f32 on the VPU (v5e-safe), broadcast over the batch tile.
    h = jnp.maximum(h + b1_ref[...], 0.0)
    # Layer 2: (TM, 512) bf16 @ (512, 128) bf16 -> f32 accumulate.
    out = jnp.dot(h.astype(jnp.bfloat16), w2_ref[...],
                  preferred_element_type=jnp.float32)
    # bf16 store (lane-dense, halves writeback bytes); wrapper upcasts.
    o_ref[...] = (out + b2_ref[...]).astype(o_ref.dtype)


def neural_net_forward(x, w1p, b1p, w2p, b2p, *, tm=512):
    """x: (B, 784) bf16 (preferred) or f32; padded params from `prepare_params`.
    Returns logits (B, 10) f32."""
    B = x.shape[0]
    # Clamp TM: (a) don't over-tile tiny batches, (b) force >= 2 grid steps so
    # the "parallel" batch axis shards across v7x's two TensorCores.
    # Multiple of 16 keeps bf16 (16, 128) sublane tiling clean.
    tm = max(16, min(tm, _round_up(pl.cdiv(B, 2), 16)))
    grid_m = pl.cdiv(B, tm)   # partial boundary block handled by Pallas; no x pad

    out = pl.pallas_call(
        mlp_kernel,
        out_shape=jax.ShapeDtypeStruct((B, OUT_PAD), jnp.bfloat16),
        grid=(grid_m,),
        in_specs=[
            pl.BlockSpec((tm, INPUT_SIZE), lambda i: (i, 0)),          # x tile (pipelined)
            pl.BlockSpec((INPUT_SIZE, HIDDEN_PAD), lambda i: (0, 0)),  # W1 resident
            pl.BlockSpec((1, HIDDEN_PAD), lambda i: (0, 0)),           # b1 resident
            pl.BlockSpec((HIDDEN_PAD, OUT_PAD), lambda i: (0, 0)),     # W2 resident
            pl.BlockSpec((1, OUT_PAD), lambda i: (0, 0)),              # b2 resident
        ],
        out_specs=pl.BlockSpec((tm, OUT_PAD), lambda i: (i, 0)),       # lane-dense store
        compiler_params=pltpu.CompilerParams(
            dimension_semantics=("parallel",)),
    )(x, w1p, b1p, w2p, b2p)

    # Slice off the lane padding and upcast once in the wrapper.
    return out[:, :NUM_CLASSES].astype(jnp.float32)


def init_params(key):
    """Deterministic init mirroring nn.Linear's uniform(-1/sqrt(fan_in), ...).
    Stored transposed vs. PyTorch: (in_features, out_features), f32."""
    k1, k2, k3, k4 = jax.random.split(key, 4)
    lim1 = 1.0 / math.sqrt(INPUT_SIZE)
    lim2 = 1.0 / math.sqrt(HIDDEN_SIZE)
    w1 = jax.random.uniform(k1, (INPUT_SIZE, HIDDEN_SIZE), jnp.float32, -lim1, lim1)
    b1 = jax.random.uniform(k2, (HIDDEN_SIZE,), jnp.float32, -lim1, lim1)
    w2 = jax.random.uniform(k3, (HIDDEN_SIZE, NUM_CLASSES), jnp.float32, -lim2, lim2)
    b2 = jax.random.uniform(k4, (NUM_CLASSES,), jnp.float32, -lim2, lim2)
    return w1, b1, w2, b2


def prepare_params(w1, b1, w2, b2):
    """One-off: zero-pad hidden 500->512 and classes 10->128; cast weights to
    bf16 (halves weight HBM traffic, native MXU path); keep biases f32.
    Zero padding is exact: padded h columns are 0 after ReLU and padded logits
    are exactly 0, then sliced away."""
    w1p = jnp.zeros((INPUT_SIZE, HIDDEN_PAD), jnp.bfloat16)
    w1p = w1p.at[:, :HIDDEN_SIZE].set(w1.astype(jnp.bfloat16))
    b1p = jnp.zeros((1, HIDDEN_PAD), jnp.float32).at[:, :HIDDEN_SIZE].set(b1)
    w2p = jnp.zeros((HIDDEN_PAD, OUT_PAD), jnp.bfloat16)
    w2p = w2p.at[:HIDDEN_SIZE, :NUM_CLASSES].set(w2.astype(jnp.bfloat16))
    b2p = jnp.zeros((1, OUT_PAD), jnp.float32).at[:, :NUM_CLASSES].set(b2)
    return w1p, b1p, w2p, b2p


if __name__ == "__main__":
    key = jax.random.PRNGKey(0)
    kx, kp = jax.random.split(key)

    # Batch that is NOT a multiple of the tile: exercises the partial boundary
    # block (no x pad) and a 2-step grid (tm clamps to 160 -> both TCs on v7x).
    batch = 300
    # Caller hands over bf16 activations directly (no extra wrapper astype pass).
    x = jax.random.normal(kx, (batch, INPUT_SIZE), jnp.bfloat16)
    w1, b1, w2, b2 = init_params(kp)
    w1p, b1p, w2p, b2p = prepare_params(w1, b1, w2, b2)

    out = jax.block_until_ready(neural_net_forward(x, w1p, b1p, w2p, b2p))
    assert out.shape == (batch, NUM_CLASSES)
    assert out.dtype == jnp.float32

    # Reference 1: same bf16-in / f32-accumulate / bf16-store path as the kernel.
    h_ref = jnp.maximum(
        jnp.dot(x, w1p, preferred_element_type=jnp.float32) + b1p, 0.0)
    ref_bf16 = (jnp.dot(h_ref.astype(jnp.bfloat16), w2p,
                        preferred_element_type=jnp.float32) + b2p
                ).astype(jnp.bfloat16)[:, :NUM_CLASSES].astype(jnp.float32)
    assert jnp.allclose(out, ref_bf16, atol=2e-2, rtol=2e-2), (
        "max abs diff vs bf16 ref:", float(jnp.max(jnp.abs(out - ref_bf16))))

    # Reference 2: full-f32 PyTorch-equivalent math (loose tol for bf16 path).
    xf = x.astype(jnp.float32)
    ref_f32 = jnp.maximum(xf @ w1 + b1, 0.0) @ w2 + b2
    assert jnp.allclose(out, ref_f32, atol=0.1, rtol=0.05), (
        "max abs diff vs f32 ref:", float(jnp.max(jnp.abs(out - ref_f32))))

    print("KERNEL_OK")
</pallas_src>

<mosaic_0001>
module attributes {stable_mosaic.version = 11 : i64} {
  func.func @mlp_kernel(%arg0: i32, %arg1: memref<160x784xbf16, #tpu.memory_space<vmem>>, %arg2: memref<784x512xbf16, #tpu.memory_space<vmem>>, %arg3: memref<1x512xf32, #tpu.memory_space<vmem>>, %arg4: memref<512x128xbf16, #tpu.memory_space<vmem>>, %arg5: memref<1x128xf32, #tpu.memory_space<vmem>>, %arg6: memref<160x128xbf16, #tpu.memory_space<vmem>>) attributes {dimension_semantics = [#tpu.dimension_semantics<parallel>], iteration_bounds = array<i64: 2>, scalar_prefetch = 0 : i64, scratch_operands = 0 : i64, tpu.core_type = #tpu.core_type<tc>, window_params = [{transform_indices = @transform_0, window_bounds = array<i64: 160, 784>}, {pipeline_mode = #tpu.pipeline_mode<synchronous>, transform_indices = @transform_1, window_bounds = array<i64: 784, 512>}, {pipeline_mode = #tpu.pipeline_mode<synchronous>, transform_indices = @transform_2, window_bounds = array<i64: 1, 512>}, {pipeline_mode = #tpu.pipeline_mode<synchronous>, transform_indices = @transform_3, window_bounds = array<i64: 512, 128>}, {pipeline_mode = #tpu.pipeline_mode<synchronous>, transform_indices = @transform_4, window_bounds = array<i64: 1, 128>}, {transform_indices = @transform_5, window_bounds = array<i64: 160, 128>}]} {
    %c0 = arith.constant 0 : index
    %c0_0 = arith.constant 0 : index
    %0 = vector.load %arg1[%c0, %c0_0] : memref<160x784xbf16, #tpu.memory_space<vmem>>, vector<160x784xbf16>
    %c0_1 = arith.constant 0 : index
    %c0_2 = arith.constant 0 : index
    %1 = vector.load %arg2[%c0_1, %c0_2] : memref<784x512xbf16, #tpu.memory_space<vmem>>, vector<784x512xbf16>
    %cst = arith.constant dense<0.000000e+00> : vector<160x512xf32>
    %2 = tpu.matmul %0, %1, %cst {dimension_numbers = #tpu.dot_dimension_numbers<[1], [0], [0], [1], [0, 0, 1, 1], [], []>} : vector<160x784xbf16>, vector<784x512xbf16>, vector<160x512xf32> -> vector<160x512xf32>
    %c0_3 = arith.constant 0 : index
    %c0_4 = arith.constant 0 : index
    %3 = vector.load %arg3[%c0_3, %c0_4] : memref<1x512xf32, #tpu.memory_space<vmem>>, vector<1x512xf32>
    %4 = vector.broadcast %3 : vector<1x512xf32> to vector<160x512xf32>
    %5 = arith.addf %2, %4 : vector<160x512xf32>
    %cst_5 = arith.constant 0.000000e+00 : f32
    %6 = vector.broadcast %cst_5 : f32 to vector<160x512xf32>
    %7 = arith.maximumf %5, %6 : vector<160x512xf32>
    %8 = arith.truncf %7 : vector<160x512xf32> to vector<160x512xbf16>
    %c0_6 = arith.constant 0 : index
    %c0_7 = arith.constant 0 : index
    %9 = vector.load %arg4[%c0_6, %c0_7] : memref<512x128xbf16, #tpu.memory_space<vmem>>, vector<512x128xbf16>
    %cst_8 = arith.constant dense<0.000000e+00> : vector<160x128xf32>
    %10 = tpu.matmul %8, %9, %cst_8 {dimension_numbers = #tpu.dot_dimension_numbers<[1], [0], [0], [1], [0, 0, 1, 1], [], []>} : vector<160x512xbf16>, vector<512x128xbf16>, vector<160x128xf32> -> vector<160x128xf32>
    %c0_9 = arith.constant 0 : index
    %c0_10 = arith.constant 0 : index
    %11 = vector.load %arg5[%c0_9, %c0_10] : memref<1x128xf32, #tpu.memory_space<vmem>>, vector<1x128xf32>
    %12 = vector.broadcast %11 : vector<1x128xf32> to vector<160x128xf32>
    %13 = arith.addf %10, %12 : vector<160x128xf32>
    %14 = arith.truncf %13 : vector<160x128xf32> to vector<160x128xbf16>
    %c0_11 = arith.constant 0 : index
    %c0_12 = arith.constant 0 : index
    %15 = vector.load %arg6[%c0_11, %c0_12] : memref<160x128xbf16, #tpu.memory_space<vmem>>, vector<160x128xbf16>
    tpu.vector_store %arg6[%c0_11, %c0_12], %14 {strides = array<i32>} : memref<160x128xbf16, #tpu.memory_space<vmem>>, vector<160x128xbf16>,
    return
  }
  func.func @transform_0(%arg0: i32) -> (i32, i32) {
    %c0_i32 = arith.constant 0 : i32
    %c0_i32_0 = arith.constant 0 : i32
    return %arg0, %c0_i32 : i32, i32
  }
  func.func @transform_1(%arg0: i32) -> (i32, i32) {
    %c0_i32 = arith.constant 0 : i32
    %c0_i32_0 = arith.constant 0 : i32
    %c0_i32_1 = arith.constant 0 : i32
    return %c0_i32, %c0_i32_0 : i32, i32
  }
  func.func @transform_2(%arg0: i32) -> (i32, i32) {
    %c0_i32 = arith.constant 0 : i32
    %c0_i32_0 = arith.constant 0 : i32
    %c0_i32_1 = arith.constant 0 : i32
    return %c0_i32, %c0_i32_0 : i32, i32
  }
  func.func @transform_3(%arg0: i32) -> (i32, i32) {
    %c0_i32 = arith.constant 0 : i32
    %c0_i32_0 = arith.constant 0 : i32
    %c0_i32_1 = arith.constant 0 : i32
    return %c0_i32, %c0_i32_0 : i32, i32
  }
  func.func @transform_4(%arg0: i32) -> (i32, i32) {
    %c0_i32 = arith.constant 0 : i32
    %c0_i32_0 = arith.constant 0 : i32
    %c0_i32_1 = arith.constant 0 : i32
    return %c0_i32, %c0_i32_0 : i32, i32
  }
  func.func @transform_5(%arg0: i32) -> (i32, i32) {
    %c0_i32 = arith.constant 0 : i32
    %c0_i32_0 = arith.constant 0 : i32
    return %arg0, %c0_i32 : i32, i32
  }
}

</mosaic_0001>

<bundles_post_ra>
// kernel: tpu_custom_call.1
= control target key start
LH: loop header
LB: loop body
LE: loop exit
PB: predicated region body
PF: predicated region fallthrough
CT: control target
= control target key end

     0   :  { %10 = vsyncpa [#allocation3], 0  ;;  %s5933_s0 = inlined_call_operand.hbm [shape: bf16[300,784], index: 0, kind: input, shape index: {}]   ;;  %s5934_s1 = inlined_call_operand.hbm [shape: bf16[784,512], index: 1, kind: input, shape index: {}]   ;;  %s5935_s2 = inlined_call_operand.vmem [shape: f32[1,512], index: 2, kind: input, shape index: {}]   ;;  %s5936_s3 = inlined_call_operand.hbm [shape: bf16[512,128], index: 3, kind: input, shape index: {}]   ;;  %s5937_s4 = inlined_call_operand.vmem [shape: f32[1,128], index: 4, kind: input, shape index: {}]   ;;  %s5938_s5 = inlined_call_operand.hbm [shape: bf16[300,128], index: 5, kind: output, shape index: {}]  }
   0x1   :  { %12 = vsyncpa [#allocation3 + $0x1], 0 }
   0x2   :  { %13 = vsyncpa [#allocation6], 0 }
   0x3   :  { %14 = vsyncpa [#allocation4], 0 }
   0x4   :  { %16 = vsyncpa [#allocation4 + $0x1], 0  ;;  %s5446_s18 = smov 0   ;;  %s5448_s19 = smov 0  }
   0x5   :  { %s5450_s20 = smov 0   ;;  %s5452_s21 = smov 0  }
   0x6 LB: > { %s5467_s22 = sadd.s32 4294967295, %s5401_s21   ;;  %s3836_s23 = sadd.s32 4294967294, %s5401_s21   ;;  %s5401_s21 = sphi %s5452_s21, %s5960_s21   ;;  %s5397_s20 = sphi %s5450_s20, %s5959_s20   ;;  %s5393_s19 = sphi %s5448_s19, %s5958_s19   ;;  %s5389_s18 = sphi %s5446_s18, %s5957_s18  }
   0x7   : > { %s5471_s24 = sadd.s32 1, %s5401_s21   ;;  %s29_s25 = sadd.s32 1, %s5397_s20 }
   0x8   : > { %s26_s26 = ssub.s32 %s5401_s21, %s5471_s24  ;;  %p36_p0 = scmp.ne.s32.totalorder %s5397_s20, %s5393_s19 }
   0x9   : > { %p27_p1 = scmp.eq.s32.totalorder %s26_s26, 0  ;;  %p37_p2 = scmp.eq.s32.totalorder %s5401_s21, 0 }
   0xa   : > { %p42_p3 = scmp.ne.s32.totalorder %s5393_s19, %s5389_s18  ;;  %p5939_p4 = scmp.eq.s32.totalorder %s5467_s22, 0 }
   0xb   : > { %s5483_s27 = scalar_select %p27_p1, %s5397_s20, %s29_s25  }
   0xc   : > { %p5485_p5 = por %p37_p2, %p36_p0  ;;  %p5491_p6 = por %p5939_p4, %p42_p3 }
   0xd   : > { %5942 = sst [smem:[#allocation12_spill]] %s5483_s27  ;;  %p150_p7 = scmp.eq.s32.totalorder %s5467_s22, 1 }
   0xe   : > { %s5943_s28 = scalar_select %p5485_p5, 1, 0 }
   0xf   : > { %s5944_s29 = scalar_select %p5491_p6, 1, 0 }
  0x10   : > { %p156_p8 = scmp.eq.s32.totalorder %s3836_s23, 1  ;;  %p3837_p9 = scmp.ge.s32.totalorder %s5401_s21, 1 }
  0x11   : > { %p163_p10 = scmp.lt.s32.totalorder %s5401_s21, 3  ;;  %p5498_p11 = por %p150_p7, %p36_p0 }
  0x12   : > { %p5502_p12 = por %p156_p8, %p42_p3  ;;  %s5403_s8 = smov [#allocation5]  }
  0x13   : > { %s5945_s30 = scalar_select %p5498_p11, 1, 0 }
  0x14   : > { %s5946_s6 = scalar_select %p5502_p12, 1, 0 }
  0x15   : > { %p5506_p13 = pnand %p3837_p9, %p163_p10  ;;  %s175_s9 = sshll.u32 %s5403_s8, 4  ;;  %s176_s9 = int_to_ptr.vmem [resolvable:$true] %s175_s9 }
  0x16   : > { %s5404_s11 = smov [#allocation7]   ;;  %s5247_s15 = scalar_lea.hbm %s5934_s1, 25088 }
  0x17   : > { %s5947_s7 = scalar_select %p5506_p13, 1, 0 }
  0x18   : > { %p4761_p1 = pneg %p5506_p13  ;;  %s191_s12 = sshll.u32 %s5404_s11, 4  ;;  %s5518_s12 = int_to_ptr.vmem [resolvable:$true] %s191_s12 }
  0x19   : > { %p5248_p0 = scmp.ne.s32.totalorder %s5934_s1, %s5247_s15  ;;  %p5254_p9 = scmp.lt.u32.totalorder %s5247_s15, %s5934_s1 }
  0x1a   : > { %p5514_p2 = pnand %p4761_p1, %p5939_p4 }
  0x1c   : > { %p5249_p3 = pneg %p5514_p2 }
  0x1e   : > { %p5250_p7 = pnand %p5249_p3, %p5248_p0 }
  0x20   : > { %p5251_p8 = pneg %p5250_p7 }
  0x22   : > { %p5256_p10 = pnand %p5254_p9, %p5251_p8 }
  0x24   : > { %5259 = shalt.err (!%p5256_p10)
}
  0x25   : > { %s5260_s26 = scalar_lea.vmem %s176_s9, 25088  ;;  %p5268_p11 = scmp.lt.s32.totalorder %s176_s9, %s176_s9 }
  0x26   : > { %p5261_p1 = scmp.ne.s32.totalorder %s176_s9, %s5260_s26  ;;  %p5269_p6 = scmp.lt.s32.totalorder %s5260_s26, %s5260_s26 }
  0x28   : > { %p5263_p4 = pnand %p5261_p1, %p5249_p3  ;;  %p5270_p13 = por %p5269_p6, %p5268_p11 }
  0x2a   : > { %p5264_p12 = pneg %p5263_p4 }
  0x2c   : > { %p5271_p5 = pnand %p5270_p13, %p5264_p12 }
  0x2e   : > { %5274 = shalt.err (!%p5271_p5)
}
  0x2f   : > { %s5405_s8 = smov 256   ;;  %s5406_s11 = smov 16  }
  0x30   : > { %4764 = dma.hbm_to_vmem [thread:$0]  (!%p5514_p2), %s5934_s1, 25088, %s176_s9, [#allocation6], %s5405_s8, %s5405_s8, %s5406_s11  }
  0x31   : > { %s5275_s17 = scalar_lea.hbm %s5936_s3, 4096 }
  0x32   : > { %p5276_p4 = scmp.ne.s32.totalorder %s5936_s3, %s5275_s17  ;;  %p5282_p11 = scmp.lt.u32.totalorder %s5275_s17, %s5936_s3 }
  0x34   : > { %p5278_p5 = pnand %p5276_p4, %p5249_p3 }
  0x36   : > { %p5279_p6 = pneg %p5278_p5 }
  0x38   : > { %p5284_p12 = pnand %p5282_p11, %p5279_p6 }
  0x3a   : > { %5287 = shalt.err (!%p5284_p12)
}
  0x3b   : > { %s5288_s9 = scalar_lea.vmem %s5518_s12, 4096  ;;  %p5296_p8 = scmp.lt.s32.totalorder %s5518_s12, %s5518_s12 }
  0x3c   : > { %p5289_p13 = scmp.ne.s32.totalorder %s5518_s12, %s5288_s9  ;;  %p5297_p9 = scmp.lt.s32.totalorder %s5288_s9, %s5288_s9 }
  0x3e   : > { %p5291_p0 = pnand %p5289_p13, %p5249_p3  ;;  %p5298_p10 = por %p5297_p9, %p5296_p8 }
  0x40   : > { %p5292_p7 = pneg %p5291_p0 }
  0x42   : > { %p5299_p1 = pnand %p5298_p10, %p5292_p7 }
  0x44   : > { %5302 = shalt.err (!%p5299_p1)
}
  0x45   : > { %s5407_s27 = smov 64   ;;  %s5408_s8 = smov 4  }
  0x46   : > { %4767 = dma.hbm_to_vmem [thread:$0]  (!%p5514_p2), %s5936_s3, 4096, %s5518_s12, [#allocation6], %s5407_s27, %s5407_s27, %s5408_s8  }
  0x47   : > { %p3840_p4 = scmp.ge.s32.totalorder %s5401_s21, 2 }
  0x48   : > { %p5949_p3 = scmp.ne.s32.totalorder (!%p3840_p4), %s5943_s28, 0 }
  0x49   : > { %204 = sbr.rel (%p3840_p4) target bundleno = 116 (0x74), region = 32 }
  0x50   : > { %207 = sbr.rel (!%p5949_p3) target bundleno = 116 (0x74), region = 36  ;;  %s208_s14 = sand.u32 (%p5949_p3), 1, %s5397_s20  }
  0x51   : > { %s213_s15 = smul.u32 (%p5949_p3), 20, %s5401_s21  ;;  %s5577_s23 = scalar_lea.sflag (%p5949_p3), [#allocation3], %s208_s14 }
  0x52   : > { %s4747_s16 = smul.u32 (%p5949_p3), 560, %s208_s14 }
  0x53   : > { %s214_s17 = ssub.s32 (%p5949_p3), 38, %s213_s15 }
  0x54   : > { %p215_p5 = scmp.lt.s32.totalorder (%p5949_p3), %s214_s17, 20  ;;  %s212_s25 = scalar_lea.vmem (%p5949_p3), [#allocation2], %s4747_s16 }
  0x57   : > { %s5962_s17 = smov (!%p215_p5, %s214_s17), 20 }
  0x58   : > { %s5574_s10 = smul.u32 448, %s5962_s17 }
  0x5a   : > { %s220_s12 = ssub.s32 8960, %s5574_s10 }
  0x5b   : > { %221 = vsyncadd %s5577_s23, %s220_s12  ;;  %p3843_p2 = scmp.ne.s32.totalorder %s5574_s10, 0  ;;  %s4774_s28 = smul.u32 8960, %s5401_s21 }
  0x5c   : > { %s227_s26 = sshll.u32 %s212_s25, 4  ;;  %s5307_s15 = scalar_lea.hbm %s5933_s0, 17024  ;;  %s5587_s26 = int_to_ptr.vmem [resolvable:$true] %s227_s26 }
  0x5d   : > { %s5585_s8 = scalar_lea.hbm %s5933_s0, %s4774_s28 }
  0x5e   : > { %s5303_s11 = scalar_lea.hbm %s5585_s8, %s5574_s10  ;;  %p5308_p13 = scmp.lt.u32.totalorder %s5585_s8, %s5933_s0 }
  0x5f   : > { %p5304_p6 = scmp.ne.s32.totalorder %s5585_s8, %s5303_s11  ;;  %p5309_p0 = scmp.lt.u32.totalorder %s5307_s15, %s5303_s11 }
  0x60   : > { %p5311_p8 = scmp.lt.u32.totalorder %s5303_s11, %s5585_s8 }
  0x61   : > { %p5305_p11 = pnand %p5304_p6, %p3843_p2  ;;  %p5310_p7 = por %p5309_p0, %p5308_p13 }
  0x63   : > { %p5306_p12 = pneg %p5305_p11  ;;  %p5312_p9 = por %p5311_p8, %p5310_p7 }
  0x65   : > { %p5313_p10 = pnand %p5312_p9, %p5306_p12 }
  0x67   : > { %5316 = shalt.err (!%p5313_p10)
}
  0x68   : > { %s5317_s12 = scalar_lea.vmem %s5587_s26, %s5574_s10  ;;  %s5409_s25 = smov [#allocation2]  }
  0x69   : > { %p5318_p1 = scmp.ne.s32.totalorder %s5587_s26, %s5317_s12  ;;  %s5321_s28 = sshll.u32 %s5409_s25, 4  ;;  %s5322_s28 = int_to_ptr.vmem [resolvable:$false] %s5321_s28 }
  0x6a   : > { %s5323_s9 = scalar_lea.vmem %s5322_s28, 17920  ;;  %p5324_p6 = scmp.lt.s32.totalorder %s5587_s26, %s5322_s28 }
  0x6b   : > { %p5319_p3 = pnand %p5318_p1, %p3843_p2  ;;  %p5325_p11 = scmp.lt.s32.totalorder %s5323_s9, %s5317_s12 }
  0x6d   : > { %p5320_p5 = pneg %p5319_p3  ;;  %p5326_p13 = por %p5325_p11, %p5324_p6 }
  0x6f   : > { %p5327_p0 = pnand %p5326_p13, %p5320_p5 }
  0x71   : > { %5330 = shalt.err (!%p5327_p0)
}
  0x72   : > { %s5410_s27 = smov 448   ;;  %s5411_s11 = smov 28  }
  0x73   : > { %233 = dma.hbm_to_vmem [thread:$0]  (%p3843_p2), %s5585_s8, %s5574_s10, %s5587_s26, %s5577_s23, %s5410_s27, %s5410_s27, %s5411_s11  }
  0x74 PF: > { %p5950_p12 = scmp.ne.s32.totalorder %s5947_s7, 0 }
  0x75   : > { %s5617_s13 = sand.u32 (!%p5950_p12), 1, %s5393_s19   ;;  %p5951_p7 = scmp.ne.s32.totalorder (!%p5950_p12), %s5944_s29, 0 }
  0x76   : > { %239 = sbr.rel (%p5950_p12) target bundleno = 980 (0x3d4), region = 40  ;;  %s242_s15 = scalar_lea.sflag (!%p5950_p12), [#allocation3], %s5617_s13 }
  0x77   : > { %s4749_s14 = smul.u32 (!%p5950_p12), 560, %s5617_s13 }
  0x79   : > { %s5621_s16 = scalar_lea.vmem (!%p5950_p12), [#allocation2], %s4749_s14 }
  0x7d   : > { %5376 = dma.done.wait (%p5951_p7), %s242_s15, 8960  }
  0x7e   : > { %5378 = vsyncadd (%p5951_p7), %s242_s15, 4294958336  ;;  %p5952_p2 = scmp.eq.s32.totalorder %s5467_s22, 0 }
  0x80   : > { %5380 = dma.done.wait (%p5952_p2), [#allocation6], 29184   ;;  %p5953_p8 = pmov %p5952_p2 }
  0x81   : > { %v4821_v0 = vld [vmem:[#allocation5 + $0x4] ss:$16 sps:$4 sm:$0xff]   ;;  %v4823_v1 = vld [vmem:[#allocation5 + $0xc] ss:$16 sps:$4 sm:$0xff]   ;;  %v4825_v2 = vld [vmem:[#allocation5] ss:$16 sps:$4 sm:$0xff]  }
  0x82   : > { %5382 = vsyncadd (%p5953_p8), [#allocation6], 4294938112  ;;  %1951 = vmatprep.subr.bf16.mxu0 %v4821_v0  ;;  %v4826_v3 = vld [vmem:[#allocation5 + $0x8] ss:$16 sps:$4 sm:$0xff]   ;;  %2483 = vmatprep.subr.bf16.mxu1 %v4823_v1  ;;  %v4827_v4 = vld [vmem:[#allocation5 + $0x24] ss:$16 sps:$4 sm:$0xff]  }
  0x83   : > { %1952 = vmatpush1.bf16.msra.mxu0 %v4825_v2  ;;  %2484 = vmatpush1.bf16.msra.mxu1 %v4826_v3  ;;  %v4829_v5 = vld [vmem:[#allocation5 + $0x2c] ss:$16 sps:$4 sm:$0xff]   ;;  %v4831_v6 = vld [vmem:[#allocation5 + $0x20] ss:$16 sps:$4 sm:$0xff]   ;;  %v4832_v7 = vld [vmem:[#allocation5 + $0x28] ss:$16 sps:$4 sm:$0xff]  }
  0x84   : > { %1953 = vmatprep.subr.bf16.mxu0 %v4827_v4  ;;  %2485 = vmatprep.subr.bf16.mxu1 %v4829_v5  ;;  %v4833_v8 = vld [vmem:[#allocation5 + $0x44] ss:$16 sps:$4 sm:$0xff]   ;;  %v4835_v9 = vld [vmem:[#allocation5 + $0x4c] ss:$16 sps:$4 sm:$0xff]   ;;  %v4837_v10 = vld [vmem:[#allocation5 + $0x40] ss:$16 sps:$4 sm:$0xff]  }
  0x85   : > { %v4838_v11 = vld [vmem:[#allocation5 + $0x48] ss:$16 sps:$4 sm:$0xff]   ;;  %v4839_v12 = vld [vmem:[#allocation5 + $0x64] ss:$16 sps:$4 sm:$0xff]   ;;  %v4841_v13 = vld [vmem:[#allocation5 + $0x6c] ss:$16 sps:$4 sm:$0xff]  }
  0x86   : > { %v4843_v14 = vld [vmem:[#allocation5 + $0x60] ss:$16 sps:$4 sm:$0xff]   ;;  %v4844_v15 = vld [vmem:[#allocation5 + $0x68] ss:$16 sps:$4 sm:$0xff]   ;;  %v4845_v16 = vld [vmem:[#allocation5 + $0x84] ss:$16 sps:$4 sm:$0xff]  }
  0x87   : > { %1954 = vmatpush1.bf16.msra.mxu0 %v4831_v6  ;;  %2486 = vmatpush1.bf16.msra.mxu1 %v4832_v7  ;;  %v4847_v17 = vld [vmem:[#allocation5 + $0x8c] ss:$16 sps:$4 sm:$0xff]   ;;  %v4849_v18 = vld [vmem:[#allocation5 + $0x80] ss:$16 sps:$4 sm:$0xff]   ;;  %v4850_v19 = vld [vmem:[#allocation5 + $0x88] ss:$16 sps:$4 sm:$0xff]  }
  0x88   : > { %1955 = vmatprep.subr.bf16.mxu0 %v4833_v8  ;;  %2487 = vmatprep.subr.bf16.mxu1 %v4835_v9  ;;  %v4851_v20 = vld [vmem:[#allocation5 + $0xa4] ss:$16 sps:$4 sm:$0xff]   ;;  %v4853_v21 = vld [vmem:[#allocation5 + $0xac] ss:$16 sps:$4 sm:$0xff]   ;;  %v4855_v22 = vld [vmem:[#allocation5 + $0xa0] ss:$16 sps:$4 sm:$0xff]  }
  0x89   : > { %v4856_v23 = vld [vmem:[#allocation5 + $0xa8] ss:$16 sps:$4 sm:$0xff]   ;;  %v4857_v24 = vld [vmem:[#allocation5 + $0xc4] ss:$16 sps:$4 sm:$0xff]   ;;  %v4859_v25 = vld [vmem:[#allocation5 + $0xcc] ss:$16 sps:$4 sm:$0xff]  }
  0x8a   : > { %v4861_v26 = vld [vmem:[#allocation5 + $0xc0] ss:$16 sps:$4 sm:$0xff]   ;;  %v4862_v27 = vld [vmem:[#allocation5 + $0xc8] ss:$16 sps:$4 sm:$0xff]   ;;  %v4863_v28 = vld [vmem:[#allocation5 + $0xe4] ss:$16 sps:$4 sm:$0xff]  }
  0x8b   : > { %1956 = vmatpush1.bf16.msra.mxu0 %v4837_v10  ;;  %2488 = vmatpush1.bf16.msra.mxu1 %v4838_v11  ;;  %v4865_v29 = vld [vmem:[#allocation5 + $0xec] ss:$16 sps:$4 sm:$0xff]   ;;  %v4867_v30 = vld [vmem:[#allocation5 + $0xe0] ss:$16 sps:$4 sm:$0xff]   ;;  %v4868_v31 = vld [vmem:[#allocation5 + $0xe8] ss:$16 sps:$4 sm:$0xff]  }
  0x8c   : > { %1957 = vmatprep.subr.bf16.mxu0 %v4839_v12  ;;  %2489 = vmatprep.subr.bf16.mxu1 %v4841_v13  ;;  %v4869_v32 = vld [vmem:[#allocation5 + $0x104] ss:$16 sps:$4 sm:$0xff]   ;;  %v4871_v33 = vld [vmem:[#allocation5 + $0x10c] ss:$16 sps:$4 sm:$0xff]   ;;  %v4873_v34 = vld [vmem:[#allocation5 + $0x100] ss:$16 sps:$4 sm:$0xff]  }
  0x8d   : > { %v4874_v35 = vld [vmem:[#allocation5 + $0x108] ss:$16 sps:$4 sm:$0xff]   ;;  %v4875_v36 = vld [vmem:[#allocation5 + $0x124] ss:$16 sps:$4 sm:$0xff]   ;;  %v4877_v37 = vld [vmem:[#allocation5 + $0x12c] ss:$16 sps:$4 sm:$0xff]  }
  0x8e   : > { %v4879_v38 = vld [vmem:[#allocation5 + $0x120] ss:$16 sps:$4 sm:$0xff]   ;;  %v4880_v39 = vld [vmem:[#allocation5 + $0x128] ss:$16 sps:$4 sm:$0xff]   ;;  %v4881_v40 = vld [vmem:[#allocation5 + $0x144] ss:$16 sps:$4 sm:$0xff]  }
  0x8f   : > { %1958 = vmatpush1.bf16.msra.mxu0 %v4843_v14  ;;  %2490 = vmatpush1.bf16.msra.mxu1 %v4844_v15  ;;  %v4883_v41 = vld [vmem:[#allocation5 + $0x14c] ss:$16 sps:$4 sm:$0xff]   ;;  %v4885_v42 = vld [vmem:[#allocation5 + $0x140] ss:$16 sps:$4 sm:$0xff]   ;;  %v4886_v43 = vld [vmem:[#allocation5 + $0x148] ss:$16 sps:$4 sm:$0xff]  }
  0x90   : > { %1959 = vmatprep.subr.bf16.mxu0 %v4845_v16  ;;  %2491 = vmatprep.subr.bf16.mxu1 %v4847_v17  ;;  %v4887_v44 = vld [vmem:[#allocation5 + $0x164] ss:$16 sps:$4 sm:$0xff]   ;;  %v4889_v45 = vld [vmem:[#allocation5 + $0x16c] ss:$16 sps:$4 sm:$0xff]   ;;  %v4891_v46 = vld [vmem:[#allocation5 + $0x160] ss:$16 sps:$4 sm:$0xff]  }
  0x91   : > { %v4892_v47 = vld [vmem:[#allocation5 + $0x168] ss:$16 sps:$4 sm:$0xff]   ;;  %v4919_v48 = vld [vmem:[%s5621_s16 + $0x4] ss:$28 sps:$4 sm:$0xff]   ;;  %v4895_v50 = vld [vmem:[#allocation5 + $0x18c] ss:$16 sps:$4 sm:$0xff]  }
  0x92   : > { %v4893_v49 = vld [vmem:[#allocation5 + $0x184] ss:$16 sps:$4 sm:$0xff]   ;;  %1983 = vmatprep.mubr.bf16.mxu0 %v4919_v48  ;;  %2515 = vmatprep.mubr.bf16.mxu1 %v4919_v48  ;;  %v4897_v51 = vld [vmem:[#allocation5 + $0x180] ss:$16 sps:$4 sm:$0xff]   ;;  %v4898_v52 = vld [vmem:[#allocation5 + $0x188] ss:$16 sps:$4 sm:$0xff]  }
  0x93   : > { %1960 = vmatpush1.bf16.msra.mxu0 %v4849_v18  ;;  %2492 = vmatpush1.bf16.msra.mxu1 %v4850_v19  ;;  %v4899_v53 = vld [vmem:[#allocation5 + $0x1a4] ss:$16 sps:$4 sm:$0xff]   ;;  %v4901_v54 = vld [vmem:[#allocation5 + $0x1ac] ss:$16 sps:$4 sm:$0xff]   ;;  %v4903_v55 = vld [vmem:[#allocation5 + $0x1a0] ss:$16 sps:$4 sm:$0xff]  }
  0x94   : > { %1961 = vmatprep.subr.bf16.mxu0 %v4851_v20  ;;  %2493 = vmatprep.subr.bf16.mxu1 %v4853_v21  ;;  %v4904_v56 = vld [vmem:[#allocation5 + $0x1a8] ss:$16 sps:$4 sm:$0xff]   ;;  %v4905_v57 = vld [vmem:[#allocation5 + $0x1c4] ss:$16 sps:$4 sm:$0xff]   ;;  %v4907_v58 = vld [vmem:[#allocation5 + $0x1cc] ss:$16 sps:$4 sm:$0xff]  }
  0x95   : > { %v4909_v59 = vld [vmem:[#allocation5 + $0x1c0] ss:$16 sps:$4 sm:$0xff]   ;;  %v4910_v60 = vld [vmem:[#allocation5 + $0x1c8] ss:$16 sps:$4 sm:$0xff]   ;;  %v4911_v61 = vld [vmem:[#allocation5 + $0x1e4] ss:$16 sps:$4 sm:$0xff]  }
  0x96   : > { %v4913_v62 = vld [vmem:[#allocation5 + $0x1ec] ss:$16 sps:$4 sm:$0xff]   ;;  %v4915_v63 = vld [vmem:[#allocation5 + $0x1e0] ss:$16 sps:$4 sm:$0xff]   ;;  %v4916_v0 = vld [vmem:[#allocation5 + $0x1e8] ss:$16 sps:$4 sm:$0xff]  }
  0x97   : > { %1962 = vmatpush1.bf16.msra.mxu0 %v4855_v22  ;;  %2494 = vmatpush1.bf16.msra.mxu1 %v4856_v23  ;;  %v4922_v1 = vld [vmem:[#allocation5 + $0x204] ss:$16 sps:$4 sm:$0xff]   ;;  %v4925_v2 = vld [vmem:[#allocation5 + $0x20c] ss:$16 sps:$4 sm:$0xff]   ;;  %v4920_v4 = vld [vmem:[#allocation5 + $0x200] ss:$16 sps:$4 sm:$0xff]  }
  0x98   : > { %1963 = vmatprep.subr.bf16.mxu0 %v4857_v24  ;;  %2495 = vmatprep.subr.bf16.mxu1 %v4859_v25  ;;  %v4917_v3 = vld [vmem:[%s5621_s16] ss:$28 sps:$4 sm:$0xff]   ;;  %v4923_v5 = vld [vmem:[#allocation5 + $0x208] ss:$16 sps:$4 sm:$0xff]   ;;  %v4928_v6 = vld [vmem:[#allocation5 + $0x224] ss:$16 sps:$4 sm:$0xff]  }
  0x99   : > { %v4929_v7 = vld [vmem:[%s5621_s16 + $0x3c] ss:$28 sps:$4 sm:$0xff]   ;;  %v4926_v9 = vld [vmem:[#allocation5 + $0x220] ss:$16 sps:$4 sm:$0xff]   ;;  %v4937_v11 = vld [vmem:[#allocation5 + $0x244] ss:$16 sps:$4 sm:$0xff]  }
  0x9a   : > { %v4933_v8 = vld [vmem:[#allocation5 + $0x22c] ss:$16 sps:$4 sm:$0xff]   ;;  %v4931_v10 = vld [vmem:[#allocation5 + $0x228] ss:$16 sps:$4 sm:$0xff]   ;;  %v4935_v14 = vld [vmem:[#allocation5 + $0x240] ss:$16 sps:$4 sm:$0xff]  }
  0x9b   : > { %1964 = vmatpush1.bf16.msra.mxu0 %v4861_v26  ;;  %2496 = vmatpush1.bf16.msra.mxu1 %v4862_v27  ;;  %v4940_v12 = vld [vmem:[#allocation5 + $0x24c] ss:$16 sps:$4 sm:$0xff]   ;;  %v4934_v13 = vld [vmem:[%s5621_s16 + $0x38] ss:$28 sps:$4 sm:$0xff]   ;;  %v4943_v19 = vld [vmem:[#allocation5 + $0x260] ss:$16 sps:$4 sm:$0xff]  }
  0x9c   : > { %1965 = vmatprep.subr.bf16.mxu0 %v4863_v28  ;;  %2497 = vmatprep.subr.bf16.mxu1 %v4865_v29  ;;  %v4938_v15 = vld [vmem:[#allocation5 + $0x248] ss:$16 sps:$4 sm:$0xff]   ;;  %v4941_v16 = vld [vmem:[%s5621_s16 + $0x74] ss:$28 sps:$4 sm:$0xff]   ;;  %v4949_v18 = vld [vmem:[#allocation5 + $0x26c] ss:$16 sps:$4 sm:$0xff]  }
  0x9d   : > { %v4945_v17 = vld [vmem:[#allocation5 + $0x264] ss:$16 sps:$4 sm:$0xff]   ;;  %v4947_v20 = vld [vmem:[#allocation5 + $0x268] ss:$16 sps:$4 sm:$0xff]   ;;  %v4955_v22 = vld [vmem:[#allocation5 + $0x28c] ss:$16 sps:$4 sm:$0xff]  }
  0x9e   : > { %v4952_v21 = vld [vmem:[#allocation5 + $0x284] ss:$16 sps:$4 sm:$0xff]   ;;  %v4946_v23 = vld [vmem:[%s5621_s16 + $0x70] ss:$28 sps:$4 sm:$0xff]   ;;  %v4953_v25 = vld [vmem:[#allocation5 + $0x288] ss:$16 sps:$4 sm:$0xff]  }
  0x9f   : > { %1966 = vmatpush1.bf16.msra.mxu0 %v4867_v30  ;;  %2498 = vmatpush1.bf16.msra.mxu1 %v4868_v31  ;;  %v4950_v24 = vld [vmem:[#allocation5 + $0x280] ss:$16 sps:$4 sm:$0xff]   ;;  %v4956_v26 = vld [vmem:[%s5621_s16 + $0xac] ss:$28 sps:$4 sm:$0xff]   ;;  %v4961_v27 = vld [vmem:[#allocation5 + $0x2a4] ss:$16 sps:$4 sm:$0xff]  }
  0xa0   : > { %1967 = vmatprep.subr.bf16.mxu0 %v4869_v32  ;;  %2499 = vmatprep.subr.bf16.mxu1 %v4871_v33  ;;  %v4964_v28 = vld [vmem:[#allocation5 + $0x2ac] ss:$16 sps:$4 sm:$0xff]   ;;  %v4959_v29 = vld [vmem:[#allocation5 + $0x2a0] ss:$16 sps:$4 sm:$0xff]   ;;  %v4962_v30 = vld [vmem:[#allocation5 + $0x2a8] ss:$16 sps:$4 sm:$0xff]  }
  0xa1   : > { %v4967_v31 = vld [vmem:[#allocation5 + $0x2c4] ss:$16 sps:$4 sm:$0xff]   ;;  %v4973_v32 = vld [vmem:[#allocation5 + $0x2cc] ss:$16 sps:$4 sm:$0xff]   ;;  %vm1920_vm0 = vcmask 130048   ;;  %s4750_s26 = smul.u32 80, %s5617_s13 }
  0xa2   : > { %v4958_v33 = vld [vmem:[%s5621_s16 + $0xa8] ss:$28 sps:$4 sm:$0xff]   ;;  %v4996_v48 = vld [vmem:[#allocation5 + $0x32c] ss:$16 sps:$4 sm:$0xff]   ;;  %s3725_s17 = scalar_lea.sflag [#allocation4], %s5617_s13  ;;  %p5954_p9 = scmp.ne.s32.totalorder %s5945_s30, 0 }
  0xa3   : > { %1968 = vmatpush1.bf16.msra.mxu0 %v4873_v34  ;;  %2500 = vmatpush1.bf16.msra.mxu1 %v4874_v35  ;;  %v4965_v34 = vld [vmem:[#allocation5 + $0x2c0] ss:$16 sps:$4 sm:$0xff]   ;;  %s5840_s8 = scalar_lea.vmem [#allocation8], %s4750_s26  ;;  %s3732_s12 = smul.u32 (%p5954_p9), 20, %s5467_s22 }
  0xa4   : > { %1969 = vmatprep.subr.bf16.mxu0 %v4875_v36  ;;  %2501 = vmatprep.subr.bf16.mxu1 %v4877_v37  ;;  %v4968_v35 = vld [vmem:[%s5621_s16 + $0xe4] ss:$28 sps:$4 sm:$0xff]   ;;  %v4971_v36 = vld [vmem:[#allocation5 + $0x2c8] ss:$16 sps:$4 sm:$0xff]  }
  0xa5   : > { %v4976_v37 = vld [vmem:[#allocation5 + $0x2e4] ss:$16 sps:$4 sm:$0xff]   ;;  %s3733_s25 = ssub.s32 (%p5954_p9), 38, %s3732_s12 }
  0xa6   : > { %p3734_p10 = scmp.lt.s32.totalorder (%p5954_p9), %s3733_s25, 20 }
  0xa7   : > { %1970 = vmatpush1.bf16.msra.mxu0 %v4879_v38  ;;  %2502 = vmatpush1.bf16.msra.mxu1 %v4880_v39  ;;  %v4979_v38 = vld [vmem:[#allocation5 + $0x2ec] ss:$16 sps:$4 sm:$0xff]   ;;  %v4974_v39 = vld [vmem:[#allocation5 + $0x2e0] ss:$16 sps:$4 sm:$0xff]  }
  0xa8   : > { %1971 = vmatprep.subr.bf16.mxu0 %v4881_v40  ;;  %2503 = vmatprep.subr.bf16.mxu1 %v4883_v41  ;;  %v4977_v40 = vld [vmem:[#allocation5 + $0x2e8] ss:$16 sps:$4 sm:$0xff]   ;;  %v4985_v41 = vld [vmem:[#allocation5 + $0x304] ss:$16 sps:$4 sm:$0xff]  }
  0xab   : > { %1972 = vmatpush1.bf16.msra.mxu0 %v4885_v42  ;;  %2504 = vmatpush1.bf16.msra.mxu1 %v4886_v43  ;;  %v4988_v42 = vld [vmem:[#allocation5 + $0x30c] ss:$16 sps:$4 sm:$0xff]  }
  0xac   : > { %1973 = vmatprep.subr.bf16.mxu0 %v4887_v44  ;;  %2505 = vmatprep.subr.bf16.mxu1 %v4889_v45  ;;  %v4970_v43 = vld [vmem:[%s5621_s16 + $0xe0] ss:$28 sps:$4 sm:$0xff]  }
  0xad   : > { %v4980_v44 = vld [vmem:[%s5621_s16 + $0x11c] ss:$28 sps:$4 sm:$0xff]   ;;  %v4983_v45 = vld [vmem:[#allocation5 + $0x300] ss:$16 sps:$4 sm:$0xff]  }
  0xaf   : > { %1974 = vmatpush1.bf16.msra.mxu0 %v4891_v46  ;;  %2506 = vmatpush1.bf16.msra.mxu1 %v4892_v47  ;;  %v4986_v46 = vld [vmem:[#allocation5 + $0x308] ss:$16 sps:$4 sm:$0xff]   ;;  %v4991_v47 = vld [vmem:[#allocation5 + $0x324] ss:$16 sps:$4 sm:$0xff]  }
  0xb0   : > { %1975 = vmatprep.subr.bf16.mxu0 %v4893_v49  ;;  %2507 = vmatprep.subr.bf16.mxu1 %v4895_v50  ;;  %v4989_v49 = vld [vmem:[#allocation5 + $0x320] ss:$16 sps:$4 sm:$0xff]   ;;  %v4994_v50 = vld [vmem:[#allocation5 + $0x328] ss:$16 sps:$4 sm:$0xff]  }
  0xb3   : > { %1976 = vmatpush1.bf16.msra.mxu0 %v4897_v51  ;;  %2508 = vmatpush1.bf16.msra.mxu1 %v4898_v52  ;;  %v5000_v51 = vld [vmem:[#allocation5 + $0x344] ss:$16 sps:$4 sm:$0xff]   ;;  %v5003_v52 = vld [vmem:[#allocation5 + $0x34c] ss:$16 sps:$4 sm:$0xff]  }
  0xb4   : > { %1977 = vmatprep.subr.bf16.mxu0 %v4899_v53  ;;  %2509 = vmatprep.subr.bf16.mxu1 %v4901_v54  ;;  %v4982_v53 = vld [vmem:[%s5621_s16 + $0x118] ss:$28 sps:$4 sm:$0xff]  }
  0xb5   : > { %v4992_v54 = vld [vmem:[%s5621_s16 + $0x154] ss:$28 sps:$4 sm:$0xff]  }
  0xb7   : > { %1978 = vmatpush1.bf16.msra.mxu0 %v4903_v55  ;;  %2510 = vmatpush1.bf16.msra.mxu1 %v4904_v56  ;;  %v4998_v55 = vld [vmem:[#allocation5 + $0x340] ss:$16 sps:$4 sm:$0xff]   ;;  %v5001_v56 = vld [vmem:[#allocation5 + $0x348] ss:$16 sps:$4 sm:$0xff]  }
  0xb8   : > { %1979 = vmatprep.subr.bf16.mxu0 %v4905_v57  ;;  %2511 = vmatprep.subr.bf16.mxu1 %v4907_v58  ;;  %v5008_v57 = vld [vmem:[#allocation5 + $0x364] ss:$16 sps:$4 sm:$0xff]   ;;  %v5012_v58 = vld [vmem:[#allocation5 + $0x36c] ss:$16 sps:$4 sm:$0xff]  }
  0xbb   : > { %1980 = vmatpush1.bf16.msra.mxu0 %v4909_v59  ;;  %2512 = vmatpush1.bf16.msra.mxu1 %v4910_v60  ;;  %v5006_v59 = vld [vmem:[#allocation5 + $0x360] ss:$16 sps:$4 sm:$0xff]   ;;  %v5010_v60 = vld [vmem:[#allocation5 + $0x368] ss:$16 sps:$4 sm:$0xff]  }
  0xbc   : > { %1981 = vmatprep.subr.bf16.mxu0 %v4911_v61  ;;  %2513 = vmatprep.subr.bf16.mxu1 %v4913_v62  ;;  %v5015_v61 = vld [vmem:[#allocation5 + $0x384] ss:$16 sps:$4 sm:$0xff]   ;;  %v5018_v62 = vld [vmem:[#allocation5 + $0x38c] ss:$16 sps:$4 sm:$0xff]  }
  0xbf   : > { %1982 = vmatpush1.bf16.msra.mxu0 %v4915_v63  ;;  %2514 = vmatpush1.bf16.msra.mxu1 %v4916_v0  ;;  %v4997_v63 = vld [vmem:[%s5621_s16 + $0x150] ss:$28 sps:$4 sm:$0xff]  }
  0xc0   : > { %2084 = vmatprep.subr.bf16.mxu0 %v4922_v1  ;;  %2616 = vmatprep.subr.bf16.mxu1 %v4925_v2  ;;  %v5004_v0 = vld [vmem:[%s5621_s16 + $0x18c] ss:$28 sps:$4 sm:$0xff]   ;;  %v5013_v1 = vld [vmem:[#allocation5 + $0x380] ss:$16 sps:$4 sm:$0xff]  }
  0xc1   : > { %v5016_v2 = vld [vmem:[#allocation5 + $0x388] ss:$16 sps:$4 sm:$0xff]  }
  0xc2   : > { %1984 = vmatmul.mubr.bf16.vlgmr.msra.gmra.mrb[0].mxu0 %v4917_v3  ;;  %2516 = vmatmul.mubr.bf16.vlgmr.msra.gmra.mrb[0].mxu1 %v4917_v3  ;;  %v5024_v3 = vld [vmem:[#allocation5 + $0x3a4] ss:$16 sps:$4 sm:$0xff]  }
  0xc3   : > { %2085 = vmatpush1.bf16.msra.mxu0 %v4920_v4  ;;  %2617 = vmatpush1.bf16.msra.mxu1 %v4923_v5  ;;  %v5027_v4 = vld [vmem:[#allocation5 + $0x3ac] ss:$16 sps:$4 sm:$0xff]   ;;  %v5022_v5 = vld [vmem:[#allocation5 + $0x3a0] ss:$16 sps:$4 sm:$0xff]  }
  0xc4   : > { %2086 = vmatprep.subr.bf16.mxu0 %v4928_v6  ;;  %1993 = vmatprep.mubr.bf16.mxu0 %v4929_v7  ;;  %v5025_v6 = vld [vmem:[#allocation5 + $0x3a8] ss:$16 sps:$4 sm:$0xff]  }
  0xc5   : > { %2525 = vmatprep.mubr.bf16.mxu1 %v4929_v7  ;;  %2618 = vmatprep.subr.bf16.mxu1 %v4933_v8  ;;  %v5030_v7 = vld [vmem:[#allocation5 + $0x3c4] ss:$16 sps:$4 sm:$0xff]   ;;  %v5036_v8 = vld [vmem:[#allocation5 + $0x3cc] ss:$16 sps:$4 sm:$0xff]  }
  0xc7   : > { %2087 = vmatpush1.bf16.msra.mxu0 %v4926_v9  ;;  %2619 = vmatpush1.bf16.msra.mxu1 %v4931_v10  ;;  %v5009_v9 = vld [vmem:[%s5621_s16 + $0x188] ss:$28 sps:$4 sm:$0xff]  }
  0xc8   : > { %2088 = vmatprep.subr.bf16.mxu0 %v4937_v11  ;;  %2620 = vmatprep.subr.bf16.mxu1 %v4940_v12  ;;  %v5019_v10 = vld [vmem:[%s5621_s16 + $0x1c4] ss:$28 sps:$4 sm:$0xff]   ;;  %v5034_v12 = vld [vmem:[#allocation5 + $0x3c8] ss:$16 sps:$4 sm:$0xff]  }
  0xc9   : > { %v5028_v11 = vld [vmem:[#allocation5 + $0x3c0] ss:$16 sps:$4 sm:$0xff]  }
  0xca   : > { %1994 = vmatmul.mubr.bf16.gmra.mrb[4].mxu0 %v4934_v13  ;;  %2526 = vmatmul.mubr.bf16.gmra.mrb[4].mxu1 %v4934_v13  ;;  %v5039_v13 = vld [vmem:[#allocation5 + $0x3e4] ss:$16 sps:$4 sm:$0xff]  }
  0xcb   : > { %2089 = vmatpush1.bf16.msra.mxu0 %v4935_v14  ;;  %2621 = vmatpush1.bf16.msra.mxu1 %v4938_v15  ;;  %v5042_v14 = vld [vmem:[#allocation5 + $0x3ec] ss:$16 sps:$4 sm:$0xff]   ;;  %v5037_v15 = vld [vmem:[#allocation5 + $0x3e0] ss:$16 sps:$4 sm:$0xff]  }
  0xcc   : > { %2003 = vmatprep.mubr.bf16.mxu0 %v4941_v16  ;;  %2090 = vmatprep.subr.bf16.mxu0 %v4945_v17  ;;  %v5048_v17 = vld [vmem:[#allocation5 + $0x404] ss:$16 sps:$4 sm:$0xff]  }
  0xcd   : > { %2535 = vmatprep.mubr.bf16.mxu1 %v4941_v16  ;;  %2622 = vmatprep.subr.bf16.mxu1 %v4949_v18  ;;  %v5040_v16 = vld [vmem:[#allocation5 + $0x3e8] ss:$16 sps:$4 sm:$0xff]   ;;  %v5051_v18 = vld [vmem:[#allocation5 + $0x40c] ss:$16 sps:$4 sm:$0xff]  }
  0xcf   : > { %2091 = vmatpush1.bf16.msra.mxu0 %v4943_v19  ;;  %2623 = vmatpush1.bf16.msra.mxu1 %v4947_v20  ;;  %v5021_v19 = vld [vmem:[%s5621_s16 + $0x1c0] ss:$28 sps:$4 sm:$0xff]  }
  0xd0   : > { %2092 = vmatprep.subr.bf16.mxu0 %v4952_v21  ;;  %2624 = vmatprep.subr.bf16.mxu1 %v4955_v22  ;;  %v5031_v20 = vld [vmem:[%s5621_s16 + $0x1fc] ss:$28 sps:$4 sm:$0xff]   ;;  %v5045_v22 = vld [vmem:[%s5621_s16 + $0xc] ss:$28 sps:$4 sm:$0xff]  }
  0xd1   : > { %v5033_v21 = vld [vmem:[%s5621_s16 + $0x1f8] ss:$28 sps:$4 sm:$0xff]  }
  0xd2   : > { %2004 = vmatmul.mubr.bf16.gmra.mrb[8].mxu0 %v4946_v23  ;;  %2536 = vmatmul.mubr.bf16.gmra.mrb[8].mxu1 %v4946_v23  ;;  %v5043_v23 = vld [vmem:[%s5621_s16 + $0x8] ss:$28 sps:$4 sm:$0xff]  }
  0xd3   : > { %2093 = vmatpush1.bf16.msra.mxu0 %v4950_v24  ;;  %2013 = vmatprep.mubr.bf16.mxu0 %v4956_v26  ;;  %v5046_v24 = vld [vmem:[#allocation5 + $0x400] ss:$16 sps:$4 sm:$0xff]  }
  0xd4   : > { %2545 = vmatprep.mubr.bf16.mxu1 %v4956_v26  ;;  %2625 = vmatpush1.bf16.msra.mxu1 %v4953_v25  ;;  %v5049_v25 = vld [vmem:[#allocation5 + $0x408] ss:$16 sps:$4 sm:$0xff]   ;;  %v5054_v26 = vld [vmem:[#allocation5 + $0x424] ss:$16 sps:$4 sm:$0xff]  }
  0xd5   : > { %2094 = vmatprep.subr.bf16.mxu0 %v4961_v27  ;;  %2626 = vmatprep.subr.bf16.mxu1 %v4964_v28  ;;  %v5055_v27 = vld [vmem:[%s5621_s16 + $0x44] ss:$28 sps:$4 sm:$0xff]   ;;  %v5059_v28 = vld [vmem:[#allocation5 + $0x42c] ss:$16 sps:$4 sm:$0xff]  }
  0xd7   : > { %2095 = vmatpush1.bf16.msra.mxu0 %v4959_v29  ;;  %v5052_v29 = vld [vmem:[#allocation5 + $0x420] ss:$16 sps:$4 sm:$0xff]  }
  0xd8   : > { %2627 = vmatpush1.bf16.msra.mxu1 %v4962_v30  ;;  %2096 = vmatprep.subr.bf16.mxu0 %v4967_v31  ;;  %v5057_v30 = vld [vmem:[#allocation5 + $0x428] ss:$16 sps:$4 sm:$0xff]   ;;  %v5063_v31 = vld [vmem:[#allocation5 + $0x444] ss:$16 sps:$4 sm:$0xff]  }
  0xd9   : > { %2628 = vmatprep.subr.bf16.mxu1 %v4973_v32  ;;  %v5066_v32 = vld [vmem:[#allocation5 + $0x44c] ss:$16 sps:$4 sm:$0xff]  }
  0xda   : > { %2014 = vmatmul.mubr.bf16.gmra.mrb[12].mxu0 %v4958_v33  ;;  %2546 = vmatmul.mubr.bf16.gmra.mrb[12].mxu1 %v4958_v33  ;;  %v5060_v33 = vld [vmem:[%s5621_s16 + $0x40] ss:$28 sps:$4 sm:$0xff]  }
  0xdb   : > { %2023 = vmatprep.mubr.bf16.mxu0 %v4968_v35  ;;  %2097 = vmatpush1.bf16.msra.mxu0 %v4965_v34  ;;  %v5061_v34 = vld [vmem:[#allocation5 + $0x440] ss:$16 sps:$4 sm:$0xff]  }
  0xdc   : > { %2555 = vmatprep.mubr.bf16.mxu1 %v4968_v35  ;;  %2629 = vmatpush1.bf16.msra.mxu1 %v4971_v36  ;;  %v5064_v35 = vld [vmem:[#allocation5 + $0x448] ss:$16 sps:$4 sm:$0xff]  }
  0xdd   : > { %2098 = vmatprep.subr.bf16.mxu0 %v4976_v37  ;;  %2630 = vmatprep.subr.bf16.mxu1 %v4979_v38  ;;  %v5067_v36 = vld [vmem:[%s5621_s16 + $0x7c] ss:$28 sps:$4 sm:$0xff]   ;;  %v5071_v37 = vld [vmem:[#allocation5 + $0x464] ss:$16 sps:$4 sm:$0xff]  }
  0xde   : > { %v5075_v38 = vld [vmem:[#allocation5 + $0x46c] ss:$16 sps:$4 sm:$0xff]  }
  0xdf   : > { %2099 = vmatpush1.bf16.msra.mxu0 %v4974_v39  ;;  %v5069_v39 = vld [vmem:[#allocation5 + $0x460] ss:$16 sps:$4 sm:$0xff]  }
  0xe0   : > { %2631 = vmatpush1.bf16.msra.mxu1 %v4977_v40  ;;  %2100 = vmatprep.subr.bf16.mxu0 %v4985_v41  ;;  %v5073_v40 = vld [vmem:[#allocation5 + $0x468] ss:$16 sps:$4 sm:$0xff]   ;;  %v5078_v41 = vld [vmem:[#allocation5 + $0x484] ss:$16 sps:$4 sm:$0xff]  }
  0xe1   : > { %2632 = vmatprep.subr.bf16.mxu1 %v4988_v42  ;;  %v5081_v42 = vld [vmem:[#allocation5 + $0x48c] ss:$16 sps:$4 sm:$0xff]  }
  0xe2   : > { %2024 = vmatmul.mubr.bf16.gmra.mrb[16].mxu0 %v4970_v43  ;;  %2556 = vmatmul.mubr.bf16.gmra.mrb[16].mxu1 %v4970_v43  ;;  %v5072_v43 = vld [vmem:[%s5621_s16 + $0x78] ss:$28 sps:$4 sm:$0xff]  }
  0xe3   : > { %2033 = vmatprep.mubr.bf16.mxu0 %v4980_v44  ;;  %2565 = vmatprep.mubr.bf16.mxu1 %v4980_v44  ;;  %v5076_v44 = vld [vmem:[#allocation5 + $0x480] ss:$16 sps:$4 sm:$0xff]  }
  0xe4   : > { %2101 = vmatpush1.bf16.msra.mxu0 %v4983_v45  ;;  %2633 = vmatpush1.bf16.msra.mxu1 %v4986_v46  ;;  %v5082_v45 = vld [vmem:[%s5621_s16 + $0xb4] ss:$28 sps:$4 sm:$0xff]   ;;  %v5079_v46 = vld [vmem:[#allocation5 + $0x488] ss:$16 sps:$4 sm:$0xff]  }
  0xe5   : > { %2102 = vmatprep.subr.bf16.mxu0 %v4991_v47  ;;  %2634 = vmatprep.subr.bf16.mxu1 %v4996_v48  ;;  %v5087_v47 = vld [vmem:[#allocation5 + $0x4a4] ss:$16 sps:$4 sm:$0xff]   ;;  %v5090_v48 = vld [vmem:[#allocation5 + $0x4ac] ss:$16 sps:$4 sm:$0xff]  }
  0xe8   : > { %2103 = vmatpush1.bf16.msra.mxu0 %v4989_v49  ;;  %2635 = vmatpush1.bf16.msra.mxu1 %v4994_v50  ;;  %v5085_v49 = vld [vmem:[#allocation5 + $0x4a0] ss:$16 sps:$4 sm:$0xff]   ;;  %v5088_v50 = vld [vmem:[#allocation5 + $0x4a8] ss:$16 sps:$4 sm:$0xff]  }
  0xe9   : > { %2104 = vmatprep.subr.bf16.mxu0 %v5000_v51  ;;  %2636 = vmatprep.subr.bf16.mxu1 %v5003_v52  ;;  %v5093_v51 = vld [vmem:[#allocation5 + $0x4c4] ss:$16 sps:$4 sm:$0xff]   ;;  %v5099_v52 = vld [vmem:[#allocation5 + $0x4cc] ss:$16 sps:$4 sm:$0xff]  }
  0xea   : > { %2034 = vmatmul.mubr.bf16.gmra.mrb[20].mxu0 %v4982_v53  ;;  %2566 = vmatmul.mubr.bf16.gmra.mrb[20].mxu1 %v4982_v53  ;;  %v5084_v53 = vld [vmem:[%s5621_s16 + $0xb0] ss:$28 sps:$4 sm:$0xff]  }
  0xeb   : > { %2043 = vmatprep.mubr.bf16.mxu0 %v4992_v54  ;;  %2575 = vmatprep.mubr.bf16.mxu1 %v4992_v54  ;;  %v5091_v54 = vld [vmem:[#allocation5 + $0x4c0] ss:$16 sps:$4 sm:$0xff]  }
  0xec   : > { %2105 = vmatpush1.bf16.msra.mxu0 %v4998_v55  ;;  %2637 = vmatpush1.bf16.msra.mxu1 %v5001_v56  ;;  %v5094_v55 = vld [vmem:[%s5621_s16 + $0xec] ss:$28 sps:$4 sm:$0xff]  }
  0xed   : > { %2106 = vmatprep.subr.bf16.mxu0 %v5008_v57  ;;  %2638 = vmatprep.subr.bf16.mxu1 %v5012_v58  ;;  %v5097_v56 = vld [vmem:[#allocation5 + $0x4c8] ss:$16 sps:$4 sm:$0xff]   ;;  %v5100_v57 = vld [vmem:[#allocation5 + $0x4e0] ss:$16 sps:$4 sm:$0xff]   ;;  %v5102_v58 = vld [vmem:[#allocation5 + $0x4e4] ss:$16 sps:$4 sm:$0xff]  }
  0xf0   : > { %2107 = vmatpush1.bf16.msra.mxu0 %v5006_v59  ;;  %2639 = vmatpush1.bf16.msra.mxu1 %v5010_v60  ;;  %v5105_v59 = vld [vmem:[#allocation5 + $0x4ec] ss:$16 sps:$4 sm:$0xff]   ;;  %v5103_v60 = vld [vmem:[#allocation5 + $0x4e8] ss:$16 sps:$4 sm:$0xff]  }
  0xf1   : > { %2108 = vmatprep.subr.bf16.mxu0 %v5015_v61  ;;  %2640 = vmatprep.subr.bf16.mxu1 %v5018_v62  ;;  %v5111_v61 = vld [vmem:[#allocation5 + $0x504] ss:$16 sps:$4 sm:$0xff]   ;;  %v5114_v62 = vld [vmem:[#allocation5 + $0x50c] ss:$16 sps:$4 sm:$0xff]  }
  0xf2   : > { %2044 = vmatmul.mubr.bf16.gmra.mrb[24].mxu0 %v4997_v63  ;;  %2576 = vmatmul.mubr.bf16.gmra.mrb[24].mxu1 %v4997_v63  ;;  %v5096_v63 = vld [vmem:[%s5621_s16 + $0xe8] ss:$28 sps:$4 sm:$0xff]  }
  0xf3   : > { %2053 = vmatprep.mubr.bf16.mxu0 %v5004_v0  ;;  %2585 = vmatprep.mubr.bf16.mxu1 %v5004_v0  ;;  %v5106_v0 = vld [vmem:[%s5621_s16 + $0x124] ss:$28 sps:$4 sm:$0xff]  }
  0xf4   : > { %2109 = vmatpush1.bf16.msra.mxu0 %v5013_v1  ;;  %2641 = vmatpush1.bf16.msra.mxu1 %v5016_v2  ;;  %v5109_v1 = vld [vmem:[#allocation5 + $0x500] ss:$16 sps:$4 sm:$0xff]   ;;  %v5112_v2 = vld [vmem:[#allocation5 + $0x508] ss:$16 sps:$4 sm:$0xff]  }
  0xf5   : > { %2110 = vmatprep.subr.bf16.mxu0 %v5024_v3  ;;  %2642 = vmatprep.subr.bf16.mxu1 %v5027_v4  ;;  %v5117_v3 = vld [vmem:[#allocation5 + $0x524] ss:$16 sps:$4 sm:$0xff]   ;;  %v5122_v4 = vld [vmem:[#allocation5 + $0x52c] ss:$16 sps:$4 sm:$0xff]  }
  0xf8   : > { %2111 = vmatpush1.bf16.msra.mxu0 %v5022_v5  ;;  %2643 = vmatpush1.bf16.msra.mxu1 %v5025_v6  ;;  %v5115_v5 = vld [vmem:[#allocation5 + $0x520] ss:$16 sps:$4 sm:$0xff]   ;;  %v5120_v6 = vld [vmem:[#allocation5 + $0x528] ss:$16 sps:$4 sm:$0xff]  }
  0xf9   : > { %2112 = vmatprep.subr.bf16.mxu0 %v5030_v7  ;;  %2644 = vmatprep.subr.bf16.mxu1 %v5036_v8  ;;  %v5126_v7 = vld [vmem:[#allocation5 + $0x544] ss:$16 sps:$4 sm:$0xff]   ;;  %v5129_v8 = vld [vmem:[#allocation5 + $0x54c] ss:$16 sps:$4 sm:$0xff]  }
  0xfa   : > { %2054 = vmatmul.mubr.bf16.gmra.mrb[28].mxu0 %v5009_v9  ;;  %2586 = vmatmul.mubr.bf16.gmra.mrb[28].mxu1 %v5009_v9  ;;  %v5108_v9 = vld [vmem:[%s5621_s16 + $0x120] ss:$28 sps:$4 sm:$0xff]  }
  0xfb   : > { %2063 = vmatprep.mubr.bf16.mxu0 %v5019_v10  ;;  %2595 = vmatprep.mubr.bf16.mxu1 %v5019_v10  ;;  %v5118_v10 = vld [vmem:[%s5621_s16 + $0x15c] ss:$28 sps:$4 sm:$0xff]  }
  0xfc   : > { %2113 = vmatpush1.bf16.msra.mxu0 %v5028_v11  ;;  %2645 = vmatpush1.bf16.msra.mxu1 %v5034_v12  ;;  %v5124_v11 = vld [vmem:[#allocation5 + $0x540] ss:$16 sps:$4 sm:$0xff]   ;;  %v5127_v12 = vld [vmem:[#allocation5 + $0x548] ss:$16 sps:$4 sm:$0xff]  }
  0xfd   : > { %2114 = vmatprep.subr.bf16.mxu0 %v5039_v13  ;;  %2646 = vmatprep.subr.bf16.mxu1 %v5042_v14  ;;  %v5134_v13 = vld [vmem:[#allocation5 + $0x564] ss:$16 sps:$4 sm:$0xff]   ;;  %v5138_v14 = vld [vmem:[#allocation5 + $0x56c] ss:$16 sps:$4 sm:$0xff]  }
 0x100   : > { %2115 = vmatpush1.bf16.msra.mxu0 %v5037_v15  ;;  %2647 = vmatpush1.bf16.msra.mxu1 %v5040_v16  ;;  %v5132_v15 = vld [vmem:[#allocation5 + $0x560] ss:$16 sps:$4 sm:$0xff]   ;;  %v5136_v16 = vld [vmem:[#allocation5 + $0x568] ss:$16 sps:$4 sm:$0xff]  }
 0x101   : > { %2217 = vmatprep.subr.bf16.mxu0 %v5048_v17  ;;  %2749 = vmatprep.subr.bf16.mxu1 %v5051_v18  ;;  %v5141_v17 = vld [vmem:[#allocation5 + $0x584] ss:$16 sps:$4 sm:$0xff]   ;;  %v5144_v18 = vld [vmem:[#allocation5 + $0x58c] ss:$16 sps:$4 sm:$0xff]  }
 0x102   : > { %2064 = vmatmul.mubr.bf16.gmra.mrb[32].mxu0 %v5021_v19  ;;  %2596 = vmatmul.mubr.bf16.gmra.mrb[32].mxu1 %v5021_v19  ;;  %v5123_v19 = vld [vmem:[%s5621_s16 + $0x158] ss:$28 sps:$4 sm:$0xff]  }
 0x103   : > { %2073 = vmatprep.mubr.bf16.mxu0 %v5031_v20  ;;  %2605 = vmatprep.mubr.bf16.mxu1 %v5031_v20  ;;  %v5130_v20 = vld [vmem:[%s5621_s16 + $0x194] ss:$28 sps:$4 sm:$0xff]  }
 0x10a   : > { %2074 = vmatmul.mubr.bf16.gmra.mrb[36].mxu0 %v5033_v21  ;;  %2606 = vmatmul.mubr.bf16.gmra.mrb[36].mxu1 %v5033_v21  ;;  %v5139_v21 = vld [vmem:[#allocation5 + $0x580] ss:$16 sps:$4 sm:$0xff]  }
 0x10b   : > { %2116 = vmatprep.mubr.bf16.mxu0 %v5045_v22  ;;  %2648 = vmatprep.mubr.bf16.mxu1 %v5045_v22  ;;  %v5142_v22 = vld [vmem:[#allocation5 + $0x588] ss:$16 sps:$4 sm:$0xff]  }
 0x112   : > { %2117 = vmatmul.mubr.bf16.vlgmr.msra.gmra.mrb[0].mxu0 %v5043_v23  ;;  %2649 = vmatmul.mubr.bf16.vlgmr.msra.gmra.mrb[0].mxu1 %v5043_v23  ;;  %v5150_v23 = vld [vmem:[#allocation5 + $0x5a4] ss:$16 sps:$4 sm:$0xff]  }
 0x113   : > { %2218 = vmatpush1.bf16.msra.mxu0 %v5046_v24  ;;  %2750 = vmatpush1.bf16.msra.mxu1 %v5049_v25  ;;  %v5153_v24 = vld [vmem:[#allocation5 + $0x5ac] ss:$16 sps:$4 sm:$0xff]   ;;  %v5148_v25 = vld [vmem:[#allocation5 + $0x5a0] ss:$16 sps:$4 sm:$0xff]  }
 0x114   : > { %2219 = vmatprep.subr.bf16.mxu0 %v5054_v26  ;;  %2126 = vmatprep.mubr.bf16.mxu0 %v5055_v27  ;;  %v5151_v26 = vld [vmem:[#allocation5 + $0x5a8] ss:$16 sps:$4 sm:$0xff]  }
 0x115   : > { %2658 = vmatprep.mubr.bf16.mxu1 %v5055_v27  ;;  %2751 = vmatprep.subr.bf16.mxu1 %v5059_v28  ;;  %v5156_v27 = vld [vmem:[#allocation5 + $0x5c4] ss:$16 sps:$4 sm:$0xff]   ;;  %v5162_v28 = vld [vmem:[#allocation5 + $0x5cc] ss:$16 sps:$4 sm:$0xff]  }
 0x117   : > { %2220 = vmatpush1.bf16.msra.mxu0 %v5052_v29  ;;  %2752 = vmatpush1.bf16.msra.mxu1 %v5057_v30  ;;  %v5135_v29 = vld [vmem:[%s5621_s16 + $0x190] ss:$28 sps:$4 sm:$0xff]  }
 0x118   : > { %2221 = vmatprep.subr.bf16.mxu0 %v5063_v31  ;;  %2753 = vmatprep.subr.bf16.mxu1 %v5066_v32  ;;  %v5145_v30 = vld [vmem:[%s5621_s16 + $0x1cc] ss:$28 sps:$4 sm:$0xff]   ;;  %v5154_v31 = vld [vmem:[#allocation5 + $0x5c0] ss:$16 sps:$4 sm:$0xff]  }
 0x119   : > { %v5160_v32 = vld [vmem:[#allocation5 + $0x5c8] ss:$16 sps:$4 sm:$0xff]  }
 0x11a   : > { %2127 = vmatmul.mubr.bf16.gmra.mrb[4].mxu0 %v5060_v33  ;;  %2659 = vmatmul.mubr.bf16.gmra.mrb[4].mxu1 %v5060_v33  ;;  %v5165_v33 = vld [vmem:[#allocation5 + $0x5e4] ss:$16 sps:$4 sm:$0xff]  }
 0x11b   : > { %2222 = vmatpush1.bf16.msra.mxu0 %v5061_v34  ;;  %2754 = vmatpush1.bf16.msra.mxu1 %v5064_v35  ;;  %v5168_v34 = vld [vmem:[#allocation5 + $0x5ec] ss:$16 sps:$4 sm:$0xff]   ;;  %v5163_v35 = vld [vmem:[#allocation5 + $0x5e0] ss:$16 sps:$4 sm:$0xff]  }
 0x11c   : > { %2136 = vmatprep.mubr.bf16.mxu0 %v5067_v36  ;;  %2223 = vmatprep.subr.bf16.mxu0 %v5071_v37  ;;  %v5174_v37 = vld [vmem:[#allocation5 + $0x604] ss:$16 sps:$4 sm:$0xff]  }
 0x11d   : > { %2668 = vmatprep.mubr.bf16.mxu1 %v5067_v36  ;;  %2755 = vmatprep.subr.bf16.mxu1 %v5075_v38  ;;  %v5166_v36 = vld [vmem:[#allocation5 + $0x5e8] ss:$16 sps:$4 sm:$0xff]   ;;  %v5177_v38 = vld [vmem:[#allocation5 + $0x60c] ss:$16 sps:$4 sm:$0xff]  }
 0x11f   : > { %2224 = vmatpush1.bf16.msra.mxu0 %v5069_v39  ;;  %2756 = vmatpush1.bf16.msra.mxu1 %v5073_v40  ;;  %v5147_v39 = vld [vmem:[%s5621_s16 + $0x1c8] ss:$28 sps:$4 sm:$0xff]  }
 0x120   : > { %2225 = vmatprep.subr.bf16.mxu0 %v5078_v41  ;;  %2757 = vmatprep.subr.bf16.mxu1 %v5081_v42  ;;  %v5157_v40 = vld [vmem:[%s5621_s16 + $0x204] ss:$28 sps:$4 sm:$0xff]   ;;  %v5171_v42 = vld [vmem:[%s5621_s16 + $0x14] ss:$28 sps:$4 sm:$0xff]  }
 0x121   : > { %v5159_v41 = vld [vmem:[%s5621_s16 + $0x200] ss:$28 sps:$4 sm:$0xff]  }
 0x122   : > { %2137 = vmatmul.mubr.bf16.gmra.mrb[8].mxu0 %v5072_v43  ;;  %2669 = vmatmul.mubr.bf16.gmra.mrb[8].mxu1 %v5072_v43  ;;  %v5169_v43 = vld [vmem:[%s5621_s16 + $0x10] ss:$28 sps:$4 sm:$0xff]  }
 0x123   : > { %2226 = vmatpush1.bf16.msra.mxu0 %v5076_v44  ;;  %2146 = vmatprep.mubr.bf16.mxu0 %v5082_v45  ;;  %v5172_v44 = vld [vmem:[#allocation5 + $0x600] ss:$16 sps:$4 sm:$0xff]  }
 0x124   : > { %2678 = vmatprep.mubr.bf16.mxu1 %v5082_v45  ;;  %2758 = vmatpush1.bf16.msra.mxu1 %v5079_v46  ;;  %v5175_v45 = vld [vmem:[#allocation5 + $0x608] ss:$16 sps:$4 sm:$0xff]  }
 0x125   : > { %2227 = vmatprep.subr.bf16.mxu0 %v5087_v47  ;;  %2759 = vmatprep.subr.bf16.mxu1 %v5090_v48  ;;  %v5178_v46 = vld [vmem:[%s5621_s16 + $0x4c] ss:$28 sps:$4 sm:$0xff]   ;;  %v5181_v48 = vld [vmem:[%s5621_s16 + $0x84] ss:$28 sps:$4 sm:$0xff]  }
 0x126   : > { %v5180_v47 = vld [vmem:[%s5621_s16 + $0x48] ss:$28 sps:$4 sm:$0xff]  }
 0x127   : > { %2228 = vmatpush1.bf16.msra.mxu0 %v5085_v49  ;;  %v5183_v49 = vld [vmem:[%s5621_s16 + $0x80] ss:$28 sps:$4 sm:$0xff]  }
 0x128   : > { %2760 = vmatpush1.bf16.msra.mxu1 %v5088_v50  ;;  %2229 = vmatprep.subr.bf16.mxu0 %v5093_v51  ;;  %v5184_v50 = vld [vmem:[%s5621_s16 + $0xbc] ss:$28 sps:$4 sm:$0xff]  }
 0x129   : > { %2761 = vmatprep.subr.bf16.mxu1 %v5099_v52  ;;  %v5186_v51 = vld [vmem:[%s5621_s16 + $0xb8] ss:$28 sps:$4 sm:$0xff]  }
 0x12a   : > { %2147 = vmatmul.mubr.bf16.gmra.mrb[12].mxu0 %v5084_v53  ;;  %2679 = vmatmul.mubr.bf16.gmra.mrb[12].mxu1 %v5084_v53  ;;  %v5187_v52 = vld [vmem:[%s5621_s16 + $0xf4] ss:$28 sps:$4 sm:$0xff]  }
 0x12b   : > { %2156 = vmatprep.mubr.bf16.mxu0 %v5094_v55  ;;  %2230 = vmatpush1.bf16.msra.mxu0 %v5091_v54  ;;  %v5215_v53 = vld [vmem:[#allocation7 + $0x40] sm:$0xff]  }
 0x12c   : > { %2688 = vmatprep.mubr.bf16.mxu1 %v5094_v55  ;;  %2762 = vmatpush1.bf16.msra.mxu1 %v5097_v56  ;;  %v5217_v54 = vld [vmem:[#allocation7 + $0xc0] sm:$0xff]   ;;  %v5190_v56 = vld [vmem:[%s5621_s16 + $0x12c] ss:$28 sps:$4 sm:$0xff]  }
 0x12d   : > { %2231 = vmatprep.subr.bf16.mxu0 %v5102_v58  ;;  %2763 = vmatprep.subr.bf16.mxu1 %v5105_v59  ;;  %v5189_v55 = vld [vmem:[%s5621_s16 + $0xf0] ss:$28 sps:$4 sm:$0xff]   ;;  %v5193_v58 = vld [vmem:[%s5621_s16 + $0x164] ss:$28 sps:$4 sm:$0xff]  }
 0x12e   : > { %v5195_v59 = vld [vmem:[%s5621_s16 + $0x160] ss:$28 sps:$4 sm:$0xff]  }
 0x12f   : > { %2232 = vmatpush1.bf16.msra.mxu0 %v5100_v57  ;;  %v5192_v57 = vld [vmem:[%s5621_s16 + $0x128] ss:$28 sps:$4 sm:$0xff]  }
 0x130   : > { %2764 = vmatpush1.bf16.msra.mxu1 %v5103_v60  ;;  %2233 = vmatprep.subr.bf16.mxu0 %v5111_v61  ;;  %v5196_v60 = vld [vmem:[%s5621_s16 + $0x19c] ss:$28 sps:$4 sm:$0xff]  }
 0x131   : > { %2765 = vmatprep.subr.bf16.mxu1 %v5114_v62  ;;  %v5198_v61 = vld [vmem:[%s5621_s16 + $0x198] ss:$28 sps:$4 sm:$0xff]  }
 0x132   : > { %2157 = vmatmul.mubr.bf16.gmra.mrb[16].mxu0 %v5096_v63  ;;  %2689 = vmatmul.mubr.bf16.gmra.mrb[16].mxu1 %v5096_v63  ;;  %v5199_v62 = vld [vmem:[%s5621_s16 + $0x1d4] ss:$28 sps:$4 sm:$0xff]  }
 0x133   : > { %2166 = vmatprep.mubr.bf16.mxu0 %v5106_v0  ;;  %2698 = vmatprep.mubr.bf16.mxu1 %v5106_v0  ;;  %v5201_v63 = vld [vmem:[%s5621_s16 + $0x1d0] ss:$28 sps:$4 sm:$0xff]  }
 0x134   : > { %2234 = vmatpush1.bf16.msra.mxu0 %v5109_v1  ;;  %2766 = vmatpush1.bf16.msra.mxu1 %v5112_v2  ;;  %v5202_v0 = vld [vmem:[%s5621_s16 + $0x20c] ss:$28 sps:$4 sm:$0xff]   ;;  %v5412_v2 = vmov 0  }
 0x135   : > { %2235 = vmatprep.subr.bf16.mxu0 %v5117_v3  ;;  %2767 = vmatprep.subr.bf16.mxu1 %v5122_v4  ;;  %v5204_v1 = vld [vmem:[%s5621_s16 + $0x208] ss:$28 sps:$4 sm:$0xff]   ;;  %v5205_v3 = vld [vmem:[%s5621_s16 + $0x18] ss:$28 sps:$4 sm:$0xff]  }
 0x136   : > { %v5216_v4 = vld [vmem:[#allocation7] sm:$0xff]  }
 0x138   : > { %2236 = vmatpush1.bf16.msra.mxu0 %v5115_v5  ;;  %2768 = vmatpush1.bf16.msra.mxu1 %v5120_v6  ;;  %v5218_v5 = vld [vmem:[#allocation7 + $0x80] sm:$0xff]   ;;  %v5219_v6 = vld [vmem:[#allocation7 + $0x48] sm:$0xff]  }
 0x139   : > { %2237 = vmatprep.subr.bf16.mxu0 %v5126_v7  ;;  %2769 = vmatprep.subr.bf16.mxu1 %v5129_v8  ;;  %v5221_v7 = vld [vmem:[#allocation7 + $0xc8] sm:$0xff]  }
 0x13a   : > { %2167 = vmatmul.mubr.bf16.gmra.mrb[20].mxu0 %v5108_v9  ;;  %2699 = vmatmul.mubr.bf16.gmra.mrb[20].mxu1 %v5108_v9  ;;  %v5220_v8 = vld [vmem:[#allocation7 + $0x8] sm:$0xff]  }
 0x13b   : > { %2176 = vmatprep.mubr.bf16.mxu0 %v5118_v10  ;;  %2708 = vmatprep.mubr.bf16.mxu1 %v5118_v10  ;;  %v5222_v9 = vld [vmem:[#allocation7 + $0x88] sm:$0xff]   ;;  %v5223_v10 = vld [vmem:[#allocation7 + $0x50] sm:$0xff]  }
 0x13c   : > { %2238 = vmatpush1.bf16.msra.mxu0 %v5124_v11  ;;  %2770 = vmatpush1.bf16.msra.mxu1 %v5127_v12  ;;  %v5225_v11 = vld [vmem:[#allocation7 + $0xd0] sm:$0xff]  }
 0x13d   : > { %2239 = vmatprep.subr.bf16.mxu0 %v5134_v13  ;;  %2771 = vmatprep.subr.bf16.mxu1 %v5138_v14  ;;  %v5206_v12 = vld [vmem:[%s5621_s16 + $0x50] ss:$28 sps:$4 sm:$0xff]  }
 0x13e   : > { %v5224_v13 = vld [vmem:[#allocation7 + $0x10] sm:$0xff]  }
 0x13f   : > { %v5226_v14 = vld [vmem:[#allocation7 + $0x90] sm:$0xff]  }
 0x140   : > { %2240 = vmatpush1.bf16.msra.mxu0 %v5132_v15  ;;  %2772 = vmatpush1.bf16.msra.mxu1 %v5136_v16  ;;  %v5227_v15 = vld [vmem:[#allocation7 + $0x58] sm:$0xff]  }
 0x141   : > { %2241 = vmatprep.subr.bf16.mxu0 %v5141_v17  ;;  %2773 = vmatprep.subr.bf16.mxu1 %v5144_v18  ;;  %v5229_v16 = vld [vmem:[#allocation7 + $0xd8] sm:$0xff]  }
 0x142   : > { %2177 = vmatmul.mubr.bf16.gmra.mrb[24].mxu0 %v5123_v19  ;;  %2709 = vmatmul.mubr.bf16.gmra.mrb[24].mxu1 %v5123_v19  ;;  %v5228_v17 = vld [vmem:[#allocation7 + $0x18] sm:$0xff]   ;;  %v5231_v19 = vld [vmem:[#allocation7 + $0x60] sm:$0xff]  }
 0x143   : > { %2186 = vmatprep.mubr.bf16.mxu0 %v5130_v20  ;;  %2718 = vmatprep.mubr.bf16.mxu1 %v5130_v20  ;;  %v5230_v18 = vld [vmem:[#allocation7 + $0x98] sm:$0xff]   ;;  %v5233_v20 = vld [vmem:[#allocation7 + $0xe0] sm:$0xff]  }
 0x144   : > { %2242 = vmatpush1.bf16.msra.mxu0 %v5139_v21  ;;  %2774 = vmatpush1.bf16.msra.mxu1 %v5142_v22  ;;  %v5207_v21 = vld [vmem:[%s5621_s16 + $0x88] ss:$28 sps:$4 sm:$0xff]  }
 0x145   : > { %2243 = vmatprep.subr.bf16.mxu0 %v5150_v23  ;;  %2775 = vmatprep.subr.bf16.mxu1 %v5153_v24  ;;  %v5232_v22 = vld [vmem:[#allocation7 + $0x20] sm:$0xff]   ;;  %v5235_v24 = vld [vmem:[#allocation7 + $0x68] sm:$0xff]  }
 0x146   : > { %v5234_v23 = vld [vmem:[#allocation7 + $0xa0] sm:$0xff]  }
 0x148   : > { %2244 = vmatpush1.bf16.msra.mxu0 %v5148_v25  ;;  %2776 = vmatpush1.bf16.msra.mxu1 %v5151_v26  ;;  %v5237_v25 = vld [vmem:[#allocation7 + $0xe8] sm:$0xff]  }
 0x149   : > { %2245 = vmatprep.subr.bf16.mxu0 %v5156_v27  ;;  %2777 = vmatprep.subr.bf16.mxu1 %v5162_v28  ;;  %v5236_v26 = vld [vmem:[#allocation7 + $0x28] sm:$0xff]   ;;  %v5239_v28 = vld [vmem:[#allocation7 + $0x70] sm:$0xff]  }
 0x14a   : > { %2187 = vmatmul.mubr.bf16.gmra.mrb[28].mxu0 %v5135_v29  ;;  %2719 = vmatmul.mubr.bf16.gmra.mrb[28].mxu1 %v5135_v29  ;;  %v5238_v27 = vld [vmem:[#allocation7 + $0xa8] sm:$0xff]   ;;  %v5241_v29 = vld [vmem:[#allocation7 + $0xf0] sm:$0xff]  }
 0x14b   : > { %2196 = vmatprep.mubr.bf16.mxu0 %v5145_v30  ;;  %2728 = vmatprep.mubr.bf16.mxu1 %v5145_v30  ;;  %v5208_v30 = vld [vmem:[%s5621_s16 + $0xc0] ss:$28 sps:$4 sm:$0xff]  }
 0x14c   : > { %2246 = vmatpush1.bf16.msra.mxu0 %v5154_v31  ;;  %2778 = vmatpush1.bf16.msra.mxu1 %v5160_v32  ;;  %v5240_v31 = vld [vmem:[#allocation7 + $0x30] sm:$0xff]  }
 0x14d   : > { %2247 = vmatprep.subr.bf16.mxu0 %v5165_v33  ;;  %2779 = vmatprep.subr.bf16.mxu1 %v5168_v34  ;;  %v5242_v32 = vld [vmem:[#allocation7 + $0xb0] sm:$0xff]  }
 0x14e   : > { %v5209_v33 = vld [vmem:[%s5621_s16 + $0xf8] ss:$28 sps:$4 sm:$0xff]   ;;  %v5210_v34 = vld [vmem:[%s5621_s16 + $0x130] ss:$28 sps:$4 sm:$0xff]  }
 0x150   : > { %2248 = vmatpush1.bf16.msra.mxu0 %v5163_v35  ;;  %2780 = vmatpush1.bf16.msra.mxu1 %v5166_v36  ;;  %v5211_v35 = vld [vmem:[%s5621_s16 + $0x168] ss:$28 sps:$4 sm:$0xff]   ;;  %v5212_v36 = vld [vmem:[%s5621_s16 + $0x1a0] ss:$28 sps:$4 sm:$0xff]  }
 0x151   : > { %2350 = vmatprep.subr.bf16.mxu0 %v5174_v37  ;;  %2882 = vmatprep.subr.bf16.mxu1 %v5177_v38  ;;  %v5213_v37 = vld [vmem:[%s5621_s16 + $0x1d8] ss:$28 sps:$4 sm:$0xff]   ;;  %v5214_v38 = vld [vmem:[%s5621_s16 + $0x210] ss:$28 sps:$4 sm:$0xff]  }
 0x152   : > { %2197 = vmatmul.mubr.bf16.gmra.mrb[32].mxu0 %v5147_v39  ;;  %2729 = vmatmul.mubr.bf16.gmra.mrb[32].mxu1 %v5147_v39  ;;  %v5243_v39 = vld [vmem:[#allocation7 + $0x78] sm:$0xff]  }
 0x153   : > { %2206 = vmatprep.mubr.bf16.mxu0 %v5157_v40  ;;  %2738 = vmatprep.mubr.bf16.mxu1 %v5157_v40  ;;  %v5245_v40 = vld [vmem:[#allocation7 + $0xf8] sm:$0xff]  }
 0x15a   : > { %2207 = vmatmul.mubr.bf16.gmra.mrb[36].mxu0 %v5159_v41  ;;  %2739 = vmatmul.mubr.bf16.gmra.mrb[36].mxu1 %v5159_v41  ;;  %v5244_v41 = vld [vmem:[#allocation7 + $0x38] sm:$0xff]  }
 0x15b   : > { %2249 = vmatprep.mubr.bf16.mxu0 %v5171_v42  ;;  %2781 = vmatprep.mubr.bf16.mxu1 %v5171_v42  ;;  %v5246_v42 = vld [vmem:[#allocation7 + $0xb8] sm:$0xff]  }
 0x162   : > { %2250 = vmatmul.mubr.bf16.vlgmr.msra.gmra.mrb[0].mxu0 %v5169_v43  ;;  %2782 = vmatmul.mubr.bf16.vlgmr.msra.gmra.mrb[0].mxu1 %v5169_v43  ;;  %v570_v43 = vlaneseq }
 0x163   : > { %2351 = vmatpush1.bf16.msra.mxu0 %v5172_v44  ;;  %2883 = vmatpush1.bf16.msra.mxu1 %v5175_v45 }
 0x164   : > { %2259 = vmatprep.mubr.bf16.mxu0 %v5178_v46  ;;  %2791 = vmatprep.mubr.bf16.mxu1 %v5178_v46  ;;  %v571_v44 = vshrl.u32 %v570_v43, 7 }
 0x165   : > { %4275 = vmatprep.subr.bf16.mxu0 %v5215_v53  ;;  %4351 = vmatprep.subr.bf16.mxu1 %v5217_v54 }
 0x166   : > { %v572_v45 = vsub.s32 0, %v571_v44  ;;  %v580_v46 = vsub.s32 2, %v571_v44 }
 0x16a   : > { %2260 = vmatmul.mubr.bf16.gmra.mrb[4].mxu0 %v5180_v47  ;;  %2792 = vmatmul.mubr.bf16.gmra.mrb[4].mxu1 %v5180_v47  ;;  %v568_v47 = vld [vmem:[%s5935_s2] sm:$0xf] }
 0x16b   : > { %2269 = vmatprep.mubr.bf16.mxu0 %v5181_v48  ;;  %2801 = vmatprep.mubr.bf16.mxu1 %v5181_v48  ;;  %v576_v48 = vsub.s32 1, %v571_v44 }
 0x172   : > { %2270 = vmatmul.mubr.bf16.gmra.mrb[8].mxu0 %v5183_v49  ;;  %2802 = vmatmul.mubr.bf16.gmra.mrb[8].mxu1 %v5183_v49  ;;  %v584_v49 = vsub.s32 3, %v571_v44 }
 0x173   : > { %2279 = vmatprep.mubr.bf16.mxu0 %v5184_v50  ;;  %2811 = vmatprep.mubr.bf16.mxu1 %v5184_v50  ;;  %v5744_v50 = vrot.slane %v568_v47, %v572_v45 }
 0x174   : > { %v5750_v53 = vrot.slane %v568_v47, %v584_v49 }
 0x17a   : > { %2280 = vmatmul.mubr.bf16.gmra.mrb[12].mxu0 %v5186_v51  ;;  %2812 = vmatmul.mubr.bf16.gmra.mrb[12].mxu1 %v5186_v51  ;;  %v5746_v51 = vrot.slane %v568_v47, %v580_v46 }
 0x17b   : > { %2289 = vmatprep.mubr.bf16.mxu0 %v5187_v52  ;;  %2821 = vmatprep.mubr.bf16.mxu1 %v5187_v52  ;;  %v5748_v52 = vrot.slane %v568_v47, %v576_v48 }
 0x182   : > { %2290 = vmatmul.mubr.bf16.gmra.mrb[16].mxu0 %v5189_v55  ;;  %2822 = vmatmul.mubr.bf16.gmra.mrb[16].mxu1 %v5189_v55 }
 0x183   : > { %2299 = vmatprep.mubr.bf16.mxu0 %v5190_v56  ;;  %2831 = vmatprep.mubr.bf16.mxu1 %v5190_v56 }
 0x18a   : > { %2300 = vmatmul.mubr.bf16.gmra.mrb[20].mxu0 %v5192_v57  ;;  %2832 = vmatmul.mubr.bf16.gmra.mrb[20].mxu1 %v5192_v57 }
 0x18b   : > { %2309 = vmatprep.mubr.bf16.mxu0 %v5193_v58  ;;  %2841 = vmatprep.mubr.bf16.mxu1 %v5193_v58 }
 0x192   : > { %2310 = vmatmul.mubr.bf16.gmra.mrb[24].mxu0 %v5195_v59  ;;  %2842 = vmatmul.mubr.bf16.gmra.mrb[24].mxu1 %v5195_v59 }
 0x193   : > { %2319 = vmatprep.mubr.bf16.mxu0 %v5196_v60  ;;  %2851 = vmatprep.mubr.bf16.mxu1 %v5196_v60 }
 0x19a   : > { %2320 = vmatmul.mubr.bf16.gmra.mrb[28].mxu0 %v5198_v61  ;;  %2852 = vmatmul.mubr.bf16.gmra.mrb[28].mxu1 %v5198_v61 }
 0x19b   : > { %2329 = vmatprep.mubr.bf16.mxu0 %v5199_v62  ;;  %2861 = vmatprep.mubr.bf16.mxu1 %v5199_v62 }
 0x1a2   : > { %2330 = vmatmul.mubr.bf16.gmra.mrb[32].mxu0 %v5201_v63  ;;  %2862 = vmatmul.mubr.bf16.gmra.mrb[32].mxu1 %v5201_v63 }
 0x1a3   : > { %2339 = vmatprep.mubr.bf16.mxu0 %v5202_v0  ;;  %2871 = vmatprep.mubr.bf16.mxu1 %v5202_v0 }
 0x1aa   : > { %2340 = vmatmul.mubr.bf16.gmra.mrb[36].mxu0 %v5204_v1  ;;  %2872 = vmatmul.mubr.bf16.gmra.mrb[36].mxu1 %v5204_v1 }
 0x1ab   : > { %2382 = vmatprep.mubr.bf16.mxu0 %v5412_v2  ;;  %2914 = vmatprep.mubr.bf16.mxu1 %v5412_v2 }
 0x1b2   : > { %4115 = vmatmul.mubr.msk.bf16.vlgmr.msra.gmra.mrb[0].mxu0 %vm1920_vm0, %v5205_v3  ;;  %4125 = vmatmul.mubr.msk.bf16.vlgmr.msra.gmra.mrb[0].mxu1 %vm1920_vm0, %v5205_v3 }
 0x1b3   : > { %2392 = vmatprep.mubr.bf16.mxu0 %v5412_v2  ;;  %2924 = vmatprep.mubr.bf16.mxu1 %v5412_v2 }
 0x1b4   : > { %4276 = vmatpush3.bf16.msra.mxu0 %v5216_v4  ;;  %4352 = vmatpush3.bf16.msra.mxu1 %v5218_v5 }
 0x1b5   : > { %4277 = vmatprep.subr.bf16.mxu0 %v5219_v6  ;;  %4353 = vmatprep.subr.bf16.mxu1 %v5221_v7 }
 0x1b8   : > { %4278 = vmatpush3.bf16.msra.mxu0 %v5220_v8  ;;  %4354 = vmatpush3.bf16.msra.mxu1 %v5222_v9 }
 0x1b9   : > { %4279 = vmatprep.subr.bf16.mxu0 %v5223_v10  ;;  %4355 = vmatprep.subr.bf16.mxu1 %v5225_v11 }
 0x1ba   : > { %4116 = vmatmul.mubr.msk.bf16.gmra.mrb[4].mxu0 %vm1920_vm0, %v5206_v12  ;;  %4126 = vmatmul.mubr.msk.bf16.gmra.mrb[4].mxu1 %vm1920_vm0, %v5206_v12 }
 0x1bb   : > { %2402 = vmatprep.mubr.bf16.mxu0 %v5412_v2  ;;  %2934 = vmatprep.mubr.bf16.mxu1 %v5412_v2 }
 0x1bc   : > { %4280 = vmatpush3.bf16.msra.mxu0 %v5224_v13  ;;  %4356 = vmatpush3.bf16.msra.mxu1 %v5226_v14 }
 0x1bd   : > { %4281 = vmatprep.subr.bf16.mxu0 %v5227_v15  ;;  %4357 = vmatprep.subr.bf16.mxu1 %v5229_v16 }
 0x1c0   : > { %4282 = vmatpush3.bf16.msra.mxu0 %v5228_v17  ;;  %4358 = vmatpush3.bf16.msra.mxu1 %v5230_v18 }
 0x1c1   : > { %4283 = vmatprep.subr.bf16.mxu0 %v5231_v19  ;;  %4359 = vmatprep.subr.bf16.mxu1 %v5233_v20 }
 0x1c2   : > { %4117 = vmatmul.mubr.msk.bf16.gmra.mrb[8].mxu0 %vm1920_vm0, %v5207_v21  ;;  %4127 = vmatmul.mubr.msk.bf16.gmra.mrb[8].mxu1 %vm1920_vm0, %v5207_v21 }
 0x1c3   : > { %2412 = vmatprep.mubr.bf16.mxu0 %v5412_v2  ;;  %2944 = vmatprep.mubr.bf16.mxu1 %v5412_v2 }
 0x1c4   : > { %4284 = vmatpush3.bf16.msra.mxu0 %v5232_v22  ;;  %4360 = vmatpush3.bf16.msra.mxu1 %v5234_v23 }
 0x1c5   : > { %4285 = vmatprep.subr.bf16.mxu0 %v5235_v24  ;;  %4361 = vmatprep.subr.bf16.mxu1 %v5237_v25 }
 0x1c8   : > { %4286 = vmatpush3.bf16.msra.mxu0 %v5236_v26  ;;  %4362 = vmatpush3.bf16.msra.mxu1 %v5238_v27 }
 0x1c9   : > { %4287 = vmatprep.subr.bf16.mxu0 %v5239_v28  ;;  %4363 = vmatprep.subr.bf16.mxu1 %v5241_v29 }
 0x1ca   : > { %4118 = vmatmul.mubr.msk.bf16.gmra.mrb[12].mxu0 %vm1920_vm0, %v5208_v30  ;;  %4128 = vmatmul.mubr.msk.bf16.gmra.mrb[12].mxu1 %vm1920_vm0, %v5208_v30 }
 0x1cb   : > { %2422 = vmatprep.mubr.bf16.mxu0 %v5412_v2  ;;  %2954 = vmatprep.mubr.bf16.mxu1 %v5412_v2 }
 0x1cc   : > { %4288 = vmatpush3.bf16.msra.mxu0 %v5240_v31  ;;  %4364 = vmatpush3.bf16.msra.mxu1 %v5242_v32 }
 0x1cd   : > { %4289 = vmatprep.subr.bf16.mxu0 %v5243_v39  ;;  %4365 = vmatprep.subr.bf16.mxu1 %v5245_v40 }
 0x1d0   : > { %4290 = vmatpush3.bf16.msra.mxu0 %v5244_v41  ;;  %4366 = vmatpush3.bf16.msra.mxu1 %v5246_v42 }
 0x1d2   : > { %4119 = vmatmul.mubr.msk.bf16.gmra.mrb[16].mxu0 %vm1920_vm0, %v5209_v33  ;;  %4129 = vmatmul.mubr.msk.bf16.gmra.mrb[16].mxu1 %vm1920_vm0, %v5209_v33 }
 0x1d3   : > { %2432 = vmatprep.mubr.bf16.mxu0 %v5412_v2  ;;  %2964 = vmatprep.mubr.bf16.mxu1 %v5412_v2 }
 0x1da   : > { %4120 = vmatmul.mubr.msk.bf16.gmra.mrb[20].mxu0 %vm1920_vm0, %v5210_v34  ;;  %4130 = vmatmul.mubr.msk.bf16.gmra.mrb[20].mxu1 %vm1920_vm0, %v5210_v34 }
 0x1db   : > { %2442 = vmatprep.mubr.bf16.mxu0 %v5412_v2  ;;  %2974 = vmatprep.mubr.bf16.mxu1 %v5412_v2 }
 0x1e2   : > { %4121 = vmatmul.mubr.msk.bf16.gmra.mrb[24].mxu0 %vm1920_vm0, %v5211_v35  ;;  %4131 = vmatmul.mubr.msk.bf16.gmra.mrb[24].mxu1 %vm1920_vm0, %v5211_v35 }
 0x1e3   : > { %2452 = vmatprep.mubr.bf16.mxu0 %v5412_v2  ;;  %2984 = vmatprep.mubr.bf16.mxu1 %v5412_v2 }
 0x1ea   : > { %4122 = vmatmul.mubr.msk.bf16.gmra.mrb[28].mxu0 %vm1920_vm0, %v5212_v36  ;;  %4132 = vmatmul.mubr.msk.bf16.gmra.mrb[28].mxu1 %vm1920_vm0, %v5212_v36 }
 0x1eb   : > { %2462 = vmatprep.mubr.bf16.mxu0 %v5412_v2  ;;  %2994 = vmatprep.mubr.bf16.mxu1 %v5412_v2 }
 0x1f2   : > { %4123 = vmatmul.mubr.msk.bf16.gmra.mrb[32].mxu0 %vm1920_vm0, %v5213_v37  ;;  %4133 = vmatmul.mubr.msk.bf16.gmra.mrb[32].mxu1 %vm1920_vm0, %v5213_v37 }
 0x1f3   : > { %2472 = vmatprep.mubr.bf16.mxu0 %v5412_v2  ;;  %3004 = vmatprep.mubr.bf16.mxu1 %v5412_v2 }
 0x1fa   : > { %4124 = vmatmul.mubr.msk.bf16.gmra.mrb[36].mxu0 %vm1920_vm0, %v5214_v38  ;;  %4134 = vmatmul.mubr.msk.bf16.gmra.mrb[36].mxu1 %vm1920_vm0, %v5214_v38 }
 0x285   : > { %v2384_v54 = vpop.f32.mrb[0].mxu0  ;;  %v2916_v55 = vpop.f32.mrb[0].mxu1 }
 0x286   : > { %v4427_v56 = vadd.f32 %v2384_v54, %v5744_v50  ;;  %v4467_v57 = vadd.f32 %v2916_v55, %v5746_v51  ;;  %v2386_v58 = vpop.f32.mrb[1].mxu0  ;;  %v2918_v59 = vpop.f32.mrb[1].mxu1 }
 0x287   : > { %v4428_v60 = vadd.f32 %v2386_v58, %v5748_v52  ;;  %v4468_v61 = vadd.f32 %v2918_v59, %v5750_v53  ;;  %v2388_v62 = vpop.f32.mrb[2].mxu0  ;;  %v2920_v63 = vpop.f32.mrb[2].mxu1 }
 0x288   : > { %v4429_v0 = vadd.f32 %v2388_v62, %v5744_v50  ;;  %v4469_v1 = vadd.f32 %v2920_v63, %v5746_v51  ;;  %v2390_v2 = vpop.f32.mrb[3].mxu0  ;;  %v2922_v3 = vpop.f32.mrb[3].mxu1  ;;  %v3015_v6 = vmax.f32 %v4427_v56, 0.0  ;;  %v3017_v7 = vmax.f32 %v4467_v57, 0.0 }
 0x289   : > { %v4430_v4 = vadd.f32 %v2390_v2, %v5748_v52  ;;  %v4470_v5 = vadd.f32 %v2922_v3, %v5750_v53  ;;  %v3016_v10 = vmax.f32 %v4428_v60, 0.0  ;;  %v3018_v11 = vmax.f32 %v4468_v61, 0.0 }
 0x28a   : > { %v3019_v8 = vmax.f32 %v4429_v0, 0.0  ;;  %v3021_v9 = vmax.f32 %v4469_v1, 0.0 }
 0x28b   : > { %v3020_v12 = vmax.f32 %v4430_v4, 0.0  ;;  %v3022_v13 = vmax.f32 %v4470_v5, 0.0 }
 0x28c   : > { %v3095_v14 = vpack.c.bf16 %v3019_v8, %v3015_v6  ;;  %v3097_v15 = vpack.c.bf16 %v3021_v9, %v3017_v7 }
 0x28d   : > { %v3096_v16 = vpack.c.bf16 %v3020_v12, %v3016_v10  ;;  %v3098_v17 = vpack.c.bf16 %v3022_v13, %v3018_v11  ;;  %v2394_v18 = vpop.f32.mrb[4].mxu0  ;;  %v2926_v19 = vpop.f32.mrb[4].mxu1 }
 0x28e   : > { %v4431_v20 = vadd.f32 %v2394_v18, %v5744_v50  ;;  %v4471_v21 = vadd.f32 %v2926_v19, %v5746_v51  ;;  %v2396_v22 = vpop.f32.mrb[5].mxu0  ;;  %v2928_v23 = vpop.f32.mrb[5].mxu1 }
 0x28f   : > { %v4432_v24 = vadd.f32 %v2396_v22, %v5748_v52  ;;  %v4472_v25 = vadd.f32 %v2928_v23, %v5750_v53  ;;  %v2398_v26 = vpop.f32.mrb[6].mxu0  ;;  %v2930_v27 = vpop.f32.mrb[6].mxu1  ;;  %3430 = vmatprep.mubr.bf16.mxu0 %v3096_v16  ;;  %3543 = vmatprep.mubr.bf16.mxu1 %v3098_v17 }
 0x290   : > { %v4433_v28 = vadd.f32 %v2398_v26, %v5744_v50  ;;  %v4473_v29 = vadd.f32 %v2930_v27, %v5746_v51  ;;  %v2400_v30 = vpop.f32.mrb[7].mxu0  ;;  %v2932_v31 = vpop.f32.mrb[7].mxu1  ;;  %3431 = vmatmul.mubr.bf16.vlgmr.msra.gmra.mrb[40].mxu0 %v3095_v14  ;;  %3544 = vmatmul.mubr.bf16.vlgmr.msra.gmra.mrb[40].mxu1 %v3097_v15  ;;  %v3023_v34 = vmax.f32 %v4431_v20, 0.0  ;;  %v3025_v35 = vmax.f32 %v4471_v21, 0.0 }
 0x291   : > { %v4434_v32 = vadd.f32 %v2400_v30, %v5748_v52  ;;  %v4474_v33 = vadd.f32 %v2932_v31, %v5750_v53  ;;  %v3024_v38 = vmax.f32 %v4432_v24, 0.0  ;;  %v3026_v39 = vmax.f32 %v4472_v25, 0.0 }
 0x292   : > { %v3027_v36 = vmax.f32 %v4433_v28, 0.0  ;;  %v3029_v37 = vmax.f32 %v4473_v29, 0.0 }
 0x293   : > { %v3028_v40 = vmax.f32 %v4434_v32, 0.0  ;;  %v3030_v41 = vmax.f32 %v4474_v33, 0.0 }
 0x294   : > { %v3099_v42 = vpack.c.bf16 %v3027_v36, %v3023_v34  ;;  %v3101_v43 = vpack.c.bf16 %v3029_v37, %v3025_v35 }
 0x295   : > { %v3100_v44 = vpack.c.bf16 %v3028_v40, %v3024_v38  ;;  %v3102_v45 = vpack.c.bf16 %v3030_v41, %v3026_v39  ;;  %v2404_v46 = vpop.f32.mrb[8].mxu0  ;;  %v2936_v47 = vpop.f32.mrb[8].mxu1 }
 0x296   : > { %v4435_v48 = vadd.f32 %v2404_v46, %v5744_v50  ;;  %v4475_v49 = vadd.f32 %v2936_v47, %v5746_v51  ;;  %v2406_v54 = vpop.f32.mrb[9].mxu0  ;;  %v2938_v55 = vpop.f32.mrb[9].mxu1 }
 0x297   : > { %v4436_v56 = vadd.f32 %v2406_v54, %v5748_v52  ;;  %v4476_v57 = vadd.f32 %v2938_v55, %v5750_v53  ;;  %v2408_v58 = vpop.f32.mrb[10].mxu0  ;;  %v2940_v59 = vpop.f32.mrb[10].mxu1  ;;  %3438 = vmatprep.mubr.bf16.mxu0 %v3100_v44  ;;  %3551 = vmatprep.mubr.bf16.mxu1 %v3102_v45 }
 0x298   : > { %v4437_v60 = vadd.f32 %v2408_v58, %v5744_v50  ;;  %v4477_v61 = vadd.f32 %v2940_v59, %v5746_v51  ;;  %v2410_v62 = vpop.f32.mrb[11].mxu0  ;;  %v2942_v63 = vpop.f32.mrb[11].mxu1  ;;  %3439 = vmatmul.mubr.bf16.gmra.mrb[44].mxu0 %v3099_v42  ;;  %3552 = vmatmul.mubr.bf16.gmra.mrb[44].mxu1 %v3101_v43  ;;  %v3031_v2 = vmax.f32 %v4435_v48, 0.0  ;;  %v3033_v3 = vmax.f32 %v4475_v49, 0.0 }
 0x299   : > { %v4438_v0 = vadd.f32 %v2410_v62, %v5748_v52  ;;  %v4478_v1 = vadd.f32 %v2942_v63, %v5750_v53  ;;  %v3032_v6 = vmax.f32 %v4436_v56, 0.0  ;;  %v3034_v7 = vmax.f32 %v4476_v57, 0.0 }
 0x29a   : > { %v3035_v4 = vmax.f32 %v4437_v60, 0.0  ;;  %v3037_v5 = vmax.f32 %v4477_v61, 0.0 }
 0x29b   : > { %v3036_v8 = vmax.f32 %v4438_v0, 0.0  ;;  %v3038_v9 = vmax.f32 %v4478_v1, 0.0 }
 0x29c   : > { %v3103_v10 = vpack.c.bf16 %v3035_v4, %v3031_v2  ;;  %v3105_v11 = vpack.c.bf16 %v3037_v5, %v3033_v3 }
 0x29d   : > { %v3104_v12 = vpack.c.bf16 %v3036_v8, %v3032_v6  ;;  %v3106_v13 = vpack.c.bf16 %v3038_v9, %v3034_v7  ;;  %v2414_v14 = vpop.f32.mrb[12].mxu0  ;;  %v2946_v15 = vpop.f32.mrb[12].mxu1 }
 0x29e   : > { %v4439_v16 = vadd.f32 %v2414_v14, %v5744_v50  ;;  %v4479_v17 = vadd.f32 %v2946_v15, %v5746_v51  ;;  %v2416_v18 = vpop.f32.mrb[13].mxu0  ;;  %v2948_v19 = vpop.f32.mrb[13].mxu1 }
 0x29f   : > { %v4440_v20 = vadd.f32 %v2416_v18, %v5748_v52  ;;  %v4480_v21 = vadd.f32 %v2948_v19, %v5750_v53  ;;  %v2418_v22 = vpop.f32.mrb[14].mxu0  ;;  %v2950_v23 = vpop.f32.mrb[14].mxu1  ;;  %3446 = vmatprep.mubr.bf16.mxu0 %v3104_v12  ;;  %3559 = vmatprep.mubr.bf16.mxu1 %v3106_v13 }
 0x2a0   : > { %v4441_v24 = vadd.f32 %v2418_v22, %v5744_v50  ;;  %v4481_v25 = vadd.f32 %v2950_v23, %v5746_v51  ;;  %v2420_v26 = vpop.f32.mrb[15].mxu0  ;;  %v2952_v27 = vpop.f32.mrb[15].mxu1  ;;  %3447 = vmatmul.mubr.bf16.gmra.mrb[48].mxu0 %v3103_v10  ;;  %3560 = vmatmul.mubr.bf16.gmra.mrb[48].mxu1 %v3105_v11  ;;  %v3039_v30 = vmax.f32 %v4439_v16, 0.0  ;;  %v3041_v31 = vmax.f32 %v4479_v17, 0.0 }
 0x2a1   : > { %v4442_v28 = vadd.f32 %v2420_v26, %v5748_v52  ;;  %v4482_v29 = vadd.f32 %v2952_v27, %v5750_v53  ;;  %v3040_v34 = vmax.f32 %v4440_v20, 0.0  ;;  %v3042_v35 = vmax.f32 %v4480_v21, 0.0 }
 0x2a2   : > { %v3043_v32 = vmax.f32 %v4441_v24, 0.0  ;;  %v3045_v33 = vmax.f32 %v4481_v25, 0.0 }
 0x2a3   : > { %v3044_v36 = vmax.f32 %v4442_v28, 0.0  ;;  %v3046_v37 = vmax.f32 %v4482_v29, 0.0 }
 0x2a4   : > { %v3107_v38 = vpack.c.bf16 %v3043_v32, %v3039_v30  ;;  %v3109_v39 = vpack.c.bf16 %v3045_v33, %v3041_v31 }
 0x2a5   : > { %v3108_v40 = vpack.c.bf16 %v3044_v36, %v3040_v34  ;;  %v3110_v41 = vpack.c.bf16 %v3046_v37, %v3042_v35  ;;  %v2424_v42 = vpop.f32.mrb[16].mxu0  ;;  %v2956_v43 = vpop.f32.mrb[16].mxu1 }
 0x2a6   : > { %v4443_v44 = vadd.f32 %v2424_v42, %v5744_v50  ;;  %v4483_v45 = vadd.f32 %v2956_v43, %v5746_v51  ;;  %v2426_v46 = vpop.f32.mrb[17].mxu0  ;;  %v2958_v47 = vpop.f32.mrb[17].mxu1 }
 0x2a7   : > { %v4444_v48 = vadd.f32 %v2426_v46, %v5748_v52  ;;  %v4484_v49 = vadd.f32 %v2958_v47, %v5750_v53  ;;  %v2428_v54 = vpop.f32.mrb[18].mxu0  ;;  %v2960_v55 = vpop.f32.mrb[18].mxu1  ;;  %3454 = vmatprep.mubr.bf16.mxu0 %v3108_v40  ;;  %3567 = vmatprep.mubr.bf16.mxu1 %v3110_v41 }
 0x2a8   : > { %v4445_v56 = vadd.f32 %v2428_v54, %v5744_v50  ;;  %v4485_v57 = vadd.f32 %v2960_v55, %v5746_v51  ;;  %v2430_v58 = vpop.f32.mrb[19].mxu0  ;;  %v2962_v59 = vpop.f32.mrb[19].mxu1  ;;  %3455 = vmatmul.mubr.bf16.gmra.mrb[52].mxu0 %v3107_v38  ;;  %3568 = vmatmul.mubr.bf16.gmra.mrb[52].mxu1 %v3109_v39  ;;  %v3047_v62 = vmax.f32 %v4443_v44, 0.0  ;;  %v3049_v63 = vmax.f32 %v4483_v45, 0.0 }
 0x2a9   : > { %v4446_v60 = vadd.f32 %v2430_v58, %v5748_v52  ;;  %v4486_v61 = vadd.f32 %v2962_v59, %v5750_v53  ;;  %v3048_v2 = vmax.f32 %v4444_v48, 0.0  ;;  %v3050_v3 = vmax.f32 %v4484_v49, 0.0 }
 0x2aa   : > { %v3051_v0 = vmax.f32 %v4445_v56, 0.0  ;;  %v3053_v1 = vmax.f32 %v4485_v57, 0.0 }
 0x2ab   : > { %v3052_v4 = vmax.f32 %v4446_v60, 0.0  ;;  %v3054_v5 = vmax.f32 %v4486_v61, 0.0 }
 0x2ac   : > { %v3111_v6 = vpack.c.bf16 %v3051_v0, %v3047_v62  ;;  %v3113_v7 = vpack.c.bf16 %v3053_v1, %v3049_v63 }
 0x2ad   : > { %v3112_v8 = vpack.c.bf16 %v3052_v4, %v3048_v2  ;;  %v3114_v9 = vpack.c.bf16 %v3054_v5, %v3050_v3  ;;  %v2434_v10 = vpop.f32.mrb[20].mxu0  ;;  %v2966_v11 = vpop.f32.mrb[20].mxu1 }
 0x2ae   : > { %v4447_v12 = vadd.f32 %v2434_v10, %v5744_v50  ;;  %v4487_v13 = vadd.f32 %v2966_v11, %v5746_v51  ;;  %v2436_v14 = vpop.f32.mrb[21].mxu0  ;;  %v2968_v15 = vpop.f32.mrb[21].mxu1 }
 0x2af   : > { %v4448_v16 = vadd.f32 %v2436_v14, %v5748_v52  ;;  %v4488_v17 = vadd.f32 %v2968_v15, %v5750_v53  ;;  %v2438_v18 = vpop.f32.mrb[22].mxu0  ;;  %v2970_v19 = vpop.f32.mrb[22].mxu1  ;;  %3462 = vmatprep.mubr.bf16.mxu0 %v3112_v8  ;;  %3575 = vmatprep.mubr.bf16.mxu1 %v3114_v9 }
 0x2b0   : > { %v4449_v20 = vadd.f32 %v2438_v18, %v5744_v50  ;;  %v4489_v21 = vadd.f32 %v2970_v19, %v5746_v51  ;;  %v2440_v22 = vpop.f32.mrb[23].mxu0  ;;  %v2972_v23 = vpop.f32.mrb[23].mxu1  ;;  %3463 = vmatmul.mubr.bf16.gmra.mrb[56].mxu0 %v3111_v6  ;;  %3576 = vmatmul.mubr.bf16.gmra.mrb[56].mxu1 %v3113_v7  ;;  %v3055_v26 = vmax.f32 %v4447_v12, 0.0  ;;  %v3057_v27 = vmax.f32 %v4487_v13, 0.0 }
 0x2b1   : > { %v4450_v24 = vadd.f32 %v2440_v22, %v5748_v52  ;;  %v4490_v25 = vadd.f32 %v2972_v23, %v5750_v53  ;;  %v3056_v30 = vmax.f32 %v4448_v16, 0.0  ;;  %v3058_v31 = vmax.f32 %v4488_v17, 0.0 }
 0x2b2   : > { %v3059_v28 = vmax.f32 %v4449_v20, 0.0  ;;  %v3061_v29 = vmax.f32 %v4489_v21, 0.0 }
 0x2b3   : > { %v3060_v32 = vmax.f32 %v4450_v24, 0.0  ;;  %v3062_v33 = vmax.f32 %v4490_v25, 0.0 }
 0x2b4   : > { %v3115_v34 = vpack.c.bf16 %v3059_v28, %v3055_v26  ;;  %v3117_v35 = vpack.c.bf16 %v3061_v29, %v3057_v27 }
 0x2b5   : > { %v3116_v36 = vpack.c.bf16 %v3060_v32, %v3056_v30  ;;  %v3118_v37 = vpack.c.bf16 %v3062_v33, %v3058_v31  ;;  %v2444_v38 = vpop.f32.mrb[24].mxu0  ;;  %v2976_v39 = vpop.f32.mrb[24].mxu1 }
 0x2b6   : > { %v4451_v40 = vadd.f32 %v2444_v38, %v5744_v50  ;;  %v4491_v41 = vadd.f32 %v2976_v39, %v5746_v51  ;;  %v2446_v42 = vpop.f32.mrb[25].mxu0  ;;  %v2978_v43 = vpop.f32.mrb[25].mxu1 }
 0x2b7   : > { %v4452_v44 = vadd.f32 %v2446_v42, %v5748_v52  ;;  %v4492_v45 = vadd.f32 %v2978_v43, %v5750_v53  ;;  %v2448_v46 = vpop.f32.mrb[26].mxu0  ;;  %v2980_v47 = vpop.f32.mrb[26].mxu1  ;;  %3470 = vmatprep.mubr.bf16.mxu0 %v3116_v36  ;;  %3583 = vmatprep.mubr.bf16.mxu1 %v3118_v37 }
 0x2b8   : > { %v4453_v48 = vadd.f32 %v2448_v46, %v5744_v50  ;;  %v4493_v49 = vadd.f32 %v2980_v47, %v5746_v51  ;;  %v2450_v54 = vpop.f32.mrb[27].mxu0  ;;  %v2982_v55 = vpop.f32.mrb[27].mxu1  ;;  %3471 = vmatmul.mubr.bf16.gmra.mrb[60].mxu0 %v3115_v34  ;;  %3584 = vmatmul.mubr.bf16.gmra.mrb[60].mxu1 %v3117_v35  ;;  %v3063_v58 = vmax.f32 %v4451_v40, 0.0  ;;  %v3065_v59 = vmax.f32 %v4491_v41, 0.0 }
 0x2b9   : > { %v4454_v56 = vadd.f32 %v2450_v54, %v5748_v52  ;;  %v4494_v57 = vadd.f32 %v2982_v55, %v5750_v53  ;;  %v3064_v62 = vmax.f32 %v4452_v44, 0.0  ;;  %v3066_v63 = vmax.f32 %v4492_v45, 0.0 }
 0x2ba   : > { %v3067_v60 = vmax.f32 %v4453_v48, 0.0  ;;  %v3069_v61 = vmax.f32 %v4493_v49, 0.0 }
 0x2bb   : > { %v3068_v0 = vmax.f32 %v4454_v56, 0.0  ;;  %v3070_v1 = vmax.f32 %v4494_v57, 0.0 }
 0x2bc   : > { %v3119_v2 = vpack.c.bf16 %v3067_v60, %v3063_v58  ;;  %v3121_v3 = vpack.c.bf16 %v3069_v61, %v3065_v59 }
 0x2bd   : > { %v3120_v4 = vpack.c.bf16 %v3068_v0, %v3064_v62  ;;  %v3122_v5 = vpack.c.bf16 %v3070_v1, %v3066_v63  ;;  %v2454_v6 = vpop.f32.mrb[28].mxu0  ;;  %v2986_v7 = vpop.f32.mrb[28].mxu1 }
 0x2be   : > { %v4455_v8 = vadd.f32 %v2454_v6, %v5744_v50  ;;  %v4495_v9 = vadd.f32 %v2986_v7, %v5746_v51  ;;  %v2456_v10 = vpop.f32.mrb[29].mxu0  ;;  %v2988_v11 = vpop.f32.mrb[29].mxu1 }
 0x2bf   : > { %v4456_v12 = vadd.f32 %v2456_v10, %v5748_v52  ;;  %v4496_v13 = vadd.f32 %v2988_v11, %v5750_v53  ;;  %v2458_v14 = vpop.f32.mrb[30].mxu0  ;;  %v2990_v15 = vpop.f32.mrb[30].mxu1  ;;  %3478 = vmatprep.mubr.bf16.mxu0 %v3120_v4  ;;  %3591 = vmatprep.mubr.bf16.mxu1 %v3122_v5 }
 0x2c0   : > { %v4457_v16 = vadd.f32 %v2458_v14, %v5744_v50  ;;  %v4497_v17 = vadd.f32 %v2990_v15, %v5746_v51  ;;  %v2460_v18 = vpop.f32.mrb[31].mxu0  ;;  %v2992_v19 = vpop.f32.mrb[31].mxu1  ;;  %3479 = vmatmul.mubr.bf16.gmra.mrb[64].mxu0 %v3119_v2  ;;  %3592 = vmatmul.mubr.bf16.gmra.mrb[64].mxu1 %v3121_v3  ;;  %v3071_v22 = vmax.f32 %v4455_v8, 0.0  ;;  %v3073_v23 = vmax.f32 %v4495_v9, 0.0 }
 0x2c1   : > { %v4458_v20 = vadd.f32 %v2460_v18, %v5748_v52  ;;  %v4498_v21 = vadd.f32 %v2992_v19, %v5750_v53  ;;  %v3072_v26 = vmax.f32 %v4456_v12, 0.0  ;;  %v3074_v27 = vmax.f32 %v4496_v13, 0.0 }
 0x2c2   : > { %v3075_v24 = vmax.f32 %v4457_v16, 0.0  ;;  %v3077_v25 = vmax.f32 %v4497_v17, 0.0 }
 0x2c3   : > { %v3076_v28 = vmax.f32 %v4458_v20, 0.0  ;;  %v3078_v29 = vmax.f32 %v4498_v21, 0.0 }
 0x2c4   : > { %v3123_v30 = vpack.c.bf16 %v3075_v24, %v3071_v22  ;;  %v3125_v31 = vpack.c.bf16 %v3077_v25, %v3073_v23 }
 0x2c5   : > { %v3124_v32 = vpack.c.bf16 %v3076_v28, %v3072_v26  ;;  %v3126_v33 = vpack.c.bf16 %v3078_v29, %v3074_v27  ;;  %v2464_v34 = vpop.f32.mrb[32].mxu0  ;;  %v2996_v35 = vpop.f32.mrb[32].mxu1 }
 0x2c6   : > { %v4459_v36 = vadd.f32 %v2464_v34, %v5744_v50  ;;  %v4499_v37 = vadd.f32 %v2996_v35, %v5746_v51  ;;  %v2466_v38 = vpop.f32.mrb[33].mxu0  ;;  %v2998_v39 = vpop.f32.mrb[33].mxu1 }
 0x2c7   : > { %v4460_v40 = vadd.f32 %v2466_v38, %v5748_v52  ;;  %v4500_v41 = vadd.f32 %v2998_v39, %v5750_v53  ;;  %v2468_v42 = vpop.f32.mrb[34].mxu0  ;;  %v3000_v43 = vpop.f32.mrb[34].mxu1  ;;  %3486 = vmatprep.mubr.bf16.mxu0 %v3124_v32  ;;  %3599 = vmatprep.mubr.bf16.mxu1 %v3126_v33 }
 0x2c8   : > { %v4461_v44 = vadd.f32 %v2468_v42, %v5744_v50  ;;  %v4501_v45 = vadd.f32 %v3000_v43, %v5746_v51  ;;  %v2470_v46 = vpop.f32.mrb[35].mxu0  ;;  %v3002_v47 = vpop.f32.mrb[35].mxu1  ;;  %3487 = vmatmul.mubr.bf16.gmra.mrb[68].mxu0 %v3123_v30  ;;  %3600 = vmatmul.mubr.bf16.gmra.mrb[68].mxu1 %v3125_v31  ;;  %v3079_v54 = vmax.f32 %v4459_v36, 0.0  ;;  %v3081_v55 = vmax.f32 %v4499_v37, 0.0 }
 0x2c9   : > { %v4462_v48 = vadd.f32 %v2470_v46, %v5748_v52  ;;  %v4502_v49 = vadd.f32 %v3002_v47, %v5750_v53  ;;  %v3080_v58 = vmax.f32 %v4460_v40, 0.0  ;;  %v3082_v59 = vmax.f32 %v4500_v41, 0.0 }
 0x2ca   : > { %v3083_v56 = vmax.f32 %v4461_v44, 0.0  ;;  %v3085_v57 = vmax.f32 %v4501_v45, 0.0 }
 0x2cb   : > { %v3084_v60 = vmax.f32 %v4462_v48, 0.0  ;;  %v3086_v61 = vmax.f32 %v4502_v49, 0.0 }
 0x2cc   : > { %v3127_v62 = vpack.c.bf16 %v3083_v56, %v3079_v54  ;;  %v3129_v63 = vpack.c.bf16 %v3085_v57, %v3081_v55 }
 0x2cd   : > { %v3128_v0 = vpack.c.bf16 %v3084_v60, %v3080_v58  ;;  %v3130_v1 = vpack.c.bf16 %v3086_v61, %v3082_v59  ;;  %v2474_v2 = vpop.f32.mrb[36].mxu0  ;;  %v3006_v3 = vpop.f32.mrb[36].mxu1 }
 0x2ce   : > { %v4463_v4 = vadd.f32 %v2474_v2, %v5744_v50  ;;  %v4503_v5 = vadd.f32 %v3006_v3, %v5746_v51  ;;  %v2476_v6 = vpop.f32.mrb[37].mxu0  ;;  %v3008_v7 = vpop.f32.mrb[37].mxu1 }
 0x2cf   : > { %v4464_v8 = vadd.f32 %v2476_v6, %v5748_v52  ;;  %v4504_v9 = vadd.f32 %v3008_v7, %v5750_v53  ;;  %v2478_v10 = vpop.f32.mrb[38].mxu0  ;;  %v3010_v11 = vpop.f32.mrb[38].mxu1  ;;  %3494 = vmatprep.mubr.bf16.mxu0 %v3128_v0  ;;  %3607 = vmatprep.mubr.bf16.mxu1 %v3130_v1 }
 0x2d0   : > { %v4465_v12 = vadd.f32 %v2478_v10, %v5744_v50  ;;  %v4505_v13 = vadd.f32 %v3010_v11, %v5746_v51  ;;  %v2480_v14 = vpop.f32.mrb[39].mxu0  ;;  %v3012_v15 = vpop.f32.mrb[39].mxu1  ;;  %3495 = vmatmul.mubr.bf16.gmra.mrb[72].mxu0 %v3127_v62  ;;  %3608 = vmatmul.mubr.bf16.gmra.mrb[72].mxu1 %v3129_v63  ;;  %v3087_v18 = vmax.f32 %v4463_v4, 0.0  ;;  %v3089_v19 = vmax.f32 %v4503_v5, 0.0 }
 0x2d1   : > { %v4466_v16 = vadd.f32 %v2480_v14, %v5748_v52  ;;  %v4506_v17 = vadd.f32 %v3012_v15, %v5750_v53  ;;  %v3088_v22 = vmax.f32 %v4464_v8, 0.0  ;;  %v3090_v23 = vmax.f32 %v4504_v9, 0.0  ;;  %v5835_v53 = vld [vmem:[%s5937_s4] ss:$0 sm:$0xff] }
 0x2d2   : > { %v3091_v20 = vmax.f32 %v4465_v12, 0.0  ;;  %v3093_v21 = vmax.f32 %v4505_v13, 0.0 }
 0x2d3   : > { %v3092_v24 = vmax.f32 %v4466_v16, 0.0  ;;  %v3094_v25 = vmax.f32 %v4506_v17, 0.0 }
 0x2d4   : > { %v3131_v26 = vpack.c.bf16 %v3091_v20, %v3087_v18  ;;  %v3133_v50 = vpack.c.bf16 %v3093_v21, %v3089_v19 }
 0x2d5   : > { %v3132_v27 = vpack.c.bf16 %v3092_v24, %v3088_v22  ;;  %v3134_v51 = vpack.c.bf16 %v3094_v25, %v3090_v23 }
 0x2d7   : > { %3502 = vmatprep.mubr.bf16.mxu0 %v3132_v27  ;;  %3615 = vmatprep.mubr.bf16.mxu1 %v3134_v51 }
 0x2d8   : > { %3503 = vmatmul.mubr.bf16.gmra.mrb[76].mxu0 %v3131_v26  ;;  %3616 = vmatmul.mubr.bf16.gmra.mrb[76].mxu1 %v3133_v50 }
 0x363   : > { %v4291_v52 = vpop.f32.mrb[40].mxu0  ;;  %v4367_v28 = vpop.f32.mrb[40].mxu1 }
 0x364   : > { %v4292_v29 = vpop.f32.mrb[41].mxu0  ;;  %v4368_v30 = vpop.f32.mrb[41].mxu1 }
 0x365   : > { %v4293_v31 = vadd.f32 %v4292_v29, %v4291_v52  ;;  %v4369_v32 = vadd.f32 %v4368_v30, %v4367_v28  ;;  %v4294_v33 = vpop.f32.mrb[42].mxu0  ;;  %v4370_v34 = vpop.f32.mrb[42].mxu1 }
 0x366   : > { %v4295_v35 = vpop.f32.mrb[43].mxu0  ;;  %v4371_v36 = vpop.f32.mrb[43].mxu1 }
 0x367   : > { %v3433_v37 = vadd.f32 %v4293_v31, %v5835_v53  ;;  %v4296_v38 = vadd.f32 %v4295_v35, %v4294_v33  ;;  %v4372_v39 = vadd.f32 %v4371_v36, %v4370_v34 }
 0x369   : > { %v3546_v40 = vadd.f32 %v4369_v32, %v3433_v37  ;;  %v3436_v41 = vadd.f32 %v4296_v38, %v5835_v53 }
 0x36b   : > { %v3549_v42 = vadd.f32 %v4372_v39, %v3436_v41  ;;  %v4297_v43 = vpop.f32.mrb[44].mxu0  ;;  %v4373_v44 = vpop.f32.mrb[44].mxu1 }
 0x36c   : > { %v4298_v45 = vpop.f32.mrb[45].mxu0  ;;  %v4374_v46 = vpop.f32.mrb[45].mxu1 }
 0x36d   : > { %v4219_v47 = vpack.c.bf16 %v3549_v42, %v3546_v40  ;;  %v4299_v48 = vadd.f32 %v4298_v45, %v4297_v43  ;;  %v4375_v49 = vadd.f32 %v4374_v46, %v4373_v44  ;;  %v4300_v54 = vpop.f32.mrb[46].mxu0  ;;  %v4376_v55 = vpop.f32.mrb[46].mxu1 }
 0x36e   : > { %v4301_v56 = vpop.f32.mrb[47].mxu0  ;;  %v4377_v57 = vpop.f32.mrb[47].mxu1 }
 0x36f   : > { %4220 = vst [vmem:[%s5840_s8] sm:$0xff] %v4219_v47   ;;  %v3441_v58 = vadd.f32 %v4299_v48, %v5835_v53  ;;  %v4302_v59 = vadd.f32 %v4301_v56, %v4300_v54  ;;  %v4378_v60 = vadd.f32 %v4377_v57, %v4376_v55 }
 0x371   : > { %v3554_v61 = vadd.f32 %v4375_v49, %v3441_v58  ;;  %v3444_v62 = vadd.f32 %v4302_v59, %v5835_v53 }
 0x373   : > { %v3557_v63 = vadd.f32 %v4378_v60, %v3444_v62  ;;  %v4303_v0 = vpop.f32.mrb[48].mxu0  ;;  %v4379_v1 = vpop.f32.mrb[48].mxu1 }
 0x374   : > { %v4304_v2 = vpop.f32.mrb[49].mxu0  ;;  %v4380_v3 = vpop.f32.mrb[49].mxu1 }
 0x375   : > { %v4224_v4 = vpack.c.bf16 %v3557_v63, %v3554_v61  ;;  %v4305_v5 = vadd.f32 %v4304_v2, %v4303_v0  ;;  %v4381_v6 = vadd.f32 %v4380_v3, %v4379_v1  ;;  %v4306_v7 = vpop.f32.mrb[50].mxu0  ;;  %v4382_v8 = vpop.f32.mrb[50].mxu1 }
 0x376   : > { %v4307_v9 = vpop.f32.mrb[51].mxu0  ;;  %v4383_v10 = vpop.f32.mrb[51].mxu1 }
 0x377   : > { %4266 = vst [vmem:[%s5840_s8 + $0x8] sm:$0xff] %v4224_v4   ;;  %v3449_v11 = vadd.f32 %v4305_v5, %v5835_v53  ;;  %v4308_v12 = vadd.f32 %v4307_v9, %v4306_v7  ;;  %v4384_v13 = vadd.f32 %v4383_v10, %v4382_v8 }
 0x379   : > { %v3562_v14 = vadd.f32 %v4381_v6, %v3449_v11  ;;  %v3452_v15 = vadd.f32 %v4308_v12, %v5835_v53 }
 0x37b   : > { %v3565_v16 = vadd.f32 %v4384_v13, %v3452_v15  ;;  %v4309_v17 = vpop.f32.mrb[52].mxu0  ;;  %v4385_v18 = vpop.f32.mrb[52].mxu1 }
 0x37c   : > { %v4310_v19 = vpop.f32.mrb[53].mxu0  ;;  %v4386_v20 = vpop.f32.mrb[53].mxu1 }
 0x37d   : > { %v4229_v21 = vpack.c.bf16 %v3565_v16, %v3562_v14  ;;  %v4311_v22 = vadd.f32 %v4310_v19, %v4309_v17  ;;  %v4387_v23 = vadd.f32 %v4386_v20, %v4385_v18  ;;  %v4312_v24 = vpop.f32.mrb[54].mxu0  ;;  %v4388_v25 = vpop.f32.mrb[54].mxu1 }
 0x37e   : > { %v4313_v26 = vpop.f32.mrb[55].mxu0  ;;  %v4389_v50 = vpop.f32.mrb[55].mxu1 }
 0x37f   : > { %4267 = vst [vmem:[%s5840_s8 + $0x10] sm:$0xff] %v4229_v21   ;;  %v3457_v27 = vadd.f32 %v4311_v22, %v5835_v53  ;;  %v4314_v51 = vadd.f32 %v4313_v26, %v4312_v24  ;;  %v4390_v52 = vadd.f32 %v4389_v50, %v4388_v25 }
 0x381   : > { %v3570_v28 = vadd.f32 %v4387_v23, %v3457_v27  ;;  %v3460_v29 = vadd.f32 %v4314_v51, %v5835_v53 }
 0x383   : > { %v3573_v30 = vadd.f32 %v4390_v52, %v3460_v29  ;;  %v4315_v31 = vpop.f32.mrb[56].mxu0  ;;  %v4391_v32 = vpop.f32.mrb[56].mxu1 }
 0x384   : > { %v4316_v33 = vpop.f32.mrb[57].mxu0  ;;  %v4392_v34 = vpop.f32.mrb[57].mxu1 }
 0x385   : > { %v4234_v35 = vpack.c.bf16 %v3573_v30, %v3570_v28  ;;  %v4317_v36 = vadd.f32 %v4316_v33, %v4315_v31  ;;  %v4393_v37 = vadd.f32 %v4392_v34, %v4391_v32  ;;  %v4318_v38 = vpop.f32.mrb[58].mxu0  ;;  %v4394_v39 = vpop.f32.mrb[58].mxu1 }
 0x386   : > { %v4319_v40 = vpop.f32.mrb[59].mxu0  ;;  %v4395_v41 = vpop.f32.mrb[59].mxu1 }
 0x387   : > { %4268 = vst [vmem:[%s5840_s8 + $0x18] sm:$0xff] %v4234_v35   ;;  %v3465_v42 = vadd.f32 %v4317_v36, %v5835_v53  ;;  %v4320_v43 = vadd.f32 %v4319_v40, %v4318_v38  ;;  %v4396_v44 = vadd.f32 %v4395_v41, %v4394_v39 }
 0x389   : > { %v3578_v45 = vadd.f32 %v4393_v37, %v3465_v42  ;;  %v3468_v46 = vadd.f32 %v4320_v43, %v5835_v53 }
 0x38b   : > { %v3581_v47 = vadd.f32 %v4396_v44, %v3468_v46  ;;  %v4321_v48 = vpop.f32.mrb[60].mxu0  ;;  %v4397_v49 = vpop.f32.mrb[60].mxu1 }
 0x38c   : > { %v4322_v54 = vpop.f32.mrb[61].mxu0  ;;  %v4398_v55 = vpop.f32.mrb[61].mxu1 }
 0x38d   : > { %v4239_v56 = vpack.c.bf16 %v3581_v47, %v3578_v45  ;;  %v4323_v57 = vadd.f32 %v4322_v54, %v4321_v48  ;;  %v4399_v58 = vadd.f32 %v4398_v55, %v4397_v49  ;;  %v4324_v59 = vpop.f32.mrb[62].mxu0  ;;  %v4400_v60 = vpop.f32.mrb[62].mxu1 }
 0x38e   : > { %v4325_v61 = vpop.f32.mrb[63].mxu0  ;;  %v4401_v62 = vpop.f32.mrb[63].mxu1 }
 0x38f   : > { %4269 = vst [vmem:[%s5840_s8 + $0x20] sm:$0xff] %v4239_v56   ;;  %v3473_v63 = vadd.f32 %v4323_v57, %v5835_v53  ;;  %v4326_v0 = vadd.f32 %v4325_v61, %v4324_v59  ;;  %v4402_v1 = vadd.f32 %v4401_v62, %v4400_v60 }
 0x391   : > { %v3586_v2 = vadd.f32 %v4399_v58, %v3473_v63  ;;  %v3476_v3 = vadd.f32 %v4326_v0, %v5835_v53 }
 0x393   : > { %v3589_v4 = vadd.f32 %v4402_v1, %v3476_v3  ;;  %v4327_v5 = vpop.f32.mrb[64].mxu0  ;;  %v4403_v6 = vpop.f32.mrb[64].mxu1 }
 0x394   : > { %v4328_v7 = vpop.f32.mrb[65].mxu0  ;;  %v4404_v8 = vpop.f32.mrb[65].mxu1 }
 0x395   : > { %v4244_v9 = vpack.c.bf16 %v3589_v4, %v3586_v2  ;;  %v4329_v10 = vadd.f32 %v4328_v7, %v4327_v5  ;;  %v4405_v11 = vadd.f32 %v4404_v8, %v4403_v6  ;;  %v4330_v12 = vpop.f32.mrb[66].mxu0  ;;  %v4406_v13 = vpop.f32.mrb[66].mxu1 }
 0x396   : > { %v4331_v14 = vpop.f32.mrb[67].mxu0  ;;  %v4407_v15 = vpop.f32.mrb[67].mxu1 }
 0x397   : > { %4270 = vst [vmem:[%s5840_s8 + $0x28] sm:$0xff] %v4244_v9   ;;  %v3481_v16 = vadd.f32 %v4329_v10, %v5835_v53  ;;  %v4332_v17 = vadd.f32 %v4331_v14, %v4330_v12  ;;  %v4408_v18 = vadd.f32 %v4407_v15, %v4406_v13 }
 0x399   : > { %v3594_v19 = vadd.f32 %v4405_v11, %v3481_v16  ;;  %v3484_v20 = vadd.f32 %v4332_v17, %v5835_v53 }
 0x39b   : > { %v3597_v21 = vadd.f32 %v4408_v18, %v3484_v20  ;;  %v4333_v22 = vpop.f32.mrb[68].mxu0  ;;  %v4409_v23 = vpop.f32.mrb[68].mxu1 }
 0x39c   : > { %v4334_v24 = vpop.f32.mrb[69].mxu0  ;;  %v4410_v25 = vpop.f32.mrb[69].mxu1 }
 0x39d   : > { %v4249_v26 = vpack.c.bf16 %v3597_v21, %v3594_v19  ;;  %v4335_v50 = vadd.f32 %v4334_v24, %v4333_v22  ;;  %v4411_v27 = vadd.f32 %v4410_v25, %v4409_v23  ;;  %v4336_v51 = vpop.f32.mrb[70].mxu0  ;;  %v4412_v52 = vpop.f32.mrb[70].mxu1 }
 0x39e   : > { %v4337_v28 = vpop.f32.mrb[71].mxu0  ;;  %v4413_v29 = vpop.f32.mrb[71].mxu1 }
 0x39f   : > { %4271 = vst [vmem:[%s5840_s8 + $0x30] sm:$0xff] %v4249_v26   ;;  %v3489_v30 = vadd.f32 %v4335_v50, %v5835_v53  ;;  %v4338_v31 = vadd.f32 %v4337_v28, %v4336_v51  ;;  %v4414_v32 = vadd.f32 %v4413_v29, %v4412_v52 }
 0x3a1   : > { %v3602_v33 = vadd.f32 %v4411_v27, %v3489_v30  ;;  %v3492_v34 = vadd.f32 %v4338_v31, %v5835_v53 }
 0x3a3   : > { %v3605_v35 = vadd.f32 %v4414_v32, %v3492_v34  ;;  %v4339_v36 = vpop.f32.mrb[72].mxu0  ;;  %v4415_v37 = vpop.f32.mrb[72].mxu1 }
 0x3a4   : > { %v4340_v38 = vpop.f32.mrb[73].mxu0  ;;  %v4416_v39 = vpop.f32.mrb[73].mxu1 }
 0x3a5   : > { %v4254_v40 = vpack.c.bf16 %v3605_v35, %v3602_v33  ;;  %v4341_v41 = vadd.f32 %v4340_v38, %v4339_v36  ;;  %v4417_v42 = vadd.f32 %v4416_v39, %v4415_v37  ;;  %v4342_v43 = vpop.f32.mrb[74].mxu0  ;;  %v4418_v44 = vpop.f32.mrb[74].mxu1 }
 0x3a6   : > { %v4343_v45 = vpop.f32.mrb[75].mxu0  ;;  %v4419_v46 = vpop.f32.mrb[75].mxu1 }
 0x3a7   : > { %4272 = vst [vmem:[%s5840_s8 + $0x38] sm:$0xff] %v4254_v40   ;;  %v3497_v47 = vadd.f32 %v4341_v41, %v5835_v53  ;;  %v4344_v48 = vadd.f32 %v4343_v45, %v4342_v43  ;;  %v4420_v49 = vadd.f32 %v4419_v46, %v4418_v44 }
 0x3a9   : > { %v3610_v54 = vadd.f32 %v4417_v42, %v3497_v47  ;;  %v3500_v55 = vadd.f32 %v4344_v48, %v5835_v53 }
 0x3ab   : > { %v3613_v56 = vadd.f32 %v4420_v49, %v3500_v55  ;;  %v4345_v57 = vpop.f32.mrb[76].mxu0  ;;  %v4421_v58 = vpop.f32.mrb[76].mxu1 }
 0x3ac   : > { %v4346_v59 = vpop.f32.mrb[77].mxu0  ;;  %v4422_v60 = vpop.f32.mrb[77].mxu1 }
 0x3ad   : > { %v4259_v61 = vpack.c.bf16 %v3613_v56, %v3610_v54  ;;  %v4347_v62 = vadd.f32 %v4346_v59, %v4345_v57  ;;  %v4423_v63 = vadd.f32 %v4422_v60, %v4421_v58  ;;  %v4348_v0 = vpop.f32.mrb[78].mxu0  ;;  %v4424_v1 = vpop.f32.mrb[78].mxu1 }
 0x3ae   : > { %v4349_v2 = vpop.f32.mrb[79].mxu0  ;;  %v4425_v3 = vpop.f32.mrb[79].mxu1 }
 0x3af   : > { %4273 = vst [vmem:[%s5840_s8 + $0x40] sm:$0xff] %v4259_v61   ;;  %v3505_v4 = vadd.f32 %v4347_v62, %v5835_v53  ;;  %v4350_v5 = vadd.f32 %v4349_v2, %v4348_v0  ;;  %v4426_v6 = vadd.f32 %v4425_v3, %v4424_v1 }
 0x3b1   : > { %v3618_v7 = vadd.f32 %v4423_v63, %v3505_v4  ;;  %v3508_v8 = vadd.f32 %v4350_v5, %v5835_v53  ;;  %3731 = sbr.rel (!%p5954_p9) target bundleno = 980 (0x3d4), region = 56 }
 0x3b3   : > { %v3621_v9 = vadd.f32 %v4426_v6, %v3508_v8 }
 0x3b5   : > { %v4264_v10 = vpack.c.bf16 %v3621_v9, %v3618_v7 }
 0x3b7   : > { %4274 = vst [vmem:[%s5840_s8 + $0x48] sm:$0xff] %v4264_v10  }
 0x3b8   : > { %s5964_s25 = smov (!%p3734_p10, %s3733_s25), 20 }
 0x3b9   : > { %s5874_s28 = sshll.u32 %s5964_s25, 6 }
 0x3ba   : > { %s3738_s9 = ssub.s32 1280, %s5874_s28 }
 0x3bb   : > { %3739 = vsyncadd %s3725_s17, %s3738_s9  ;;  %p4189_p1 = scmp.ne.s32.totalorder %s5874_s28, 0  ;;  %s4215_s30 = smul.u32 1280, %s5467_s22 }
 0x3bc   : > { %s3744_s27 = sshll.u32 %s5840_s8, 4  ;;  %s5413_s29 = smov [#allocation8]   ;;  %s5887_s27 = int_to_ptr.vmem [resolvable:$true] %s3744_s27 }
 0x3bd   : > { %s5885_s15 = scalar_lea.hbm %s5938_s5, %s4215_s30  ;;  %s5331_s16 = scalar_lea.vmem %s5887_s27, %s5874_s28 }
 0x3be   : > { %p5332_p3 = scmp.ne.s32.totalorder %s5887_s27, %s5331_s16  ;;  %s5335_s7 = sshll.u32 %s5413_s29, 4  ;;  %s5336_s7 = int_to_ptr.vmem [resolvable:$false] %s5335_s7 }
 0x3bf   : > { %s5337_s22 = scalar_lea.vmem %s5336_s7, 2560  ;;  %p5338_p11 = scmp.lt.s32.totalorder %s5887_s27, %s5336_s7 }
 0x3c0   : > { %p5333_p5 = pnand %p5332_p3, %p4189_p1  ;;  %p5339_p13 = scmp.lt.s32.totalorder %s5337_s22, %s5331_s16 }
 0x3c2   : > { %p5334_p6 = pneg %p5333_p5  ;;  %p5340_p0 = por %p5339_p13, %p5338_p11 }
 0x3c4   : > { %p5341_p12 = pnand %p5340_p0, %p5334_p6 }
 0x3c6   : > { %5344 = shalt.err (!%p5341_p12)
}
 0x3c7   : > { %s5345_s10 = scalar_lea.hbm %s5885_s15, %s5874_s28  ;;  %s5349_s8 = scalar_lea.hbm %s5938_s5, 2432 }
 0x3c8   : > { %p5346_p7 = scmp.ne.s32.totalorder %s5885_s15, %s5345_s10  ;;  %p5350_p9 = scmp.lt.u32.totalorder %s5885_s15, %s5938_s5 }
 0x3c9   : > { %p5351_p10 = scmp.lt.u32.totalorder %s5349_s8, %s5345_s10  ;;  %p5353_p5 = scmp.lt.u32.totalorder %s5345_s10, %s5885_s15 }
 0x3ca   : > { %p5347_p2 = pnand %p5346_p7, %p4189_p1 }
 0x3cb   : > { %p5352_p3 = por %p5351_p10, %p5350_p9 }
 0x3cc   : > { %p5348_p8 = pneg %p5347_p2 }
 0x3cd   : > { %p5354_p6 = por %p5353_p5, %p5352_p3 }
 0x3cf   : > { %p5355_p11 = pnand %p5354_p6, %p5348_p8 }
 0x3d1   : > { %5358 = shalt.err (!%p5355_p11)
}
 0x3d2   : > { %s5414_s9 = smov 64   ;;  %s5415_s30 = smov 4  }
 0x3d3   : > { %3750 = dma.vmem_to_hbm [thread:$0]  (%p4189_p1), %s5887_s27, %s5874_s28, %s5885_s15, %s3725_s17, %s5414_s9, %s5414_s9, %s5415_s30  }
 0x3d4 PF: > { %s3759_s11 = sand.u32 1, %s5389_s18   ;;  %p5955_p13 = scmp.ne.s32.totalorder %s5946_s6, 0 }
 0x3d5   : > { %s3760_s14 = scalar_lea.sflag [#allocation4], %s3759_s11 }
 0x3d6   : > { %p4769_p0 = pnand %p3840_p4, %p5955_p13 }
 0x3d8   : > { %5384 = dma.done.wait (!%p4769_p0), %s3760_s14, 1280  }
 0x3d9   : > { %5386 = vsyncadd (!%p4769_p0), %s3760_s14, 4294966016  ;;  %s5956_s16 = sld [smem:[#allocation12_spill]]  ;;  %p19_p12 = scmp.ge.s32.totalorder %s5471_s24, 4  }
 0x3da   : > { %s5957_s18 = smov %s5393_s19  ;;  %s5958_s19 = smov %s5397_s20 }
 0x3db   : > { %s5960_s21 = smov %s5471_s24  ;;  %21 = sbr.rel (!%p19_p12) target bundleno = 6 (0x6), region = 93 }
 0x3df   : > { %s5959_s20 = smov %s5956_s16 }
 0x3e2   :  { %3765 = vsyncpa [#allocation3], 1 }
 0x3e3   :  { %3767 = vsyncpa [#allocation3 + $0x1], 1 }
 0x3e4   :  { %3768 = vsyncpa [#allocation6], 1 }
 0x3e5   :  { %3769 = vsyncpa [#allocation4], 1 }
 0x3e6   :  { %3771 = vsyncpa [#allocation4 + $0x1], 1 }

</bundles_post_ra>
